<compile_context>
chip_gen: v6e
topology: v6e:2x2x1
jax: 0.10.0
libtpu: 0.0.40
codegen_flags: <defaults>
</compile_context>

<pallas_src>
import functools

import jax
import jax.numpy as jnp
from jax import lax
from jax.experimental import pallas as pl
from jax.experimental.pallas import tpu as pltpu

LANE = 128  # TPU lane width (v5e/v6e/v7x)


def _round_up(n, m):
    return ((n + m - 1) // m) * m


def _device_kind():
    try:
        return jax.devices()[0].device_kind.lower()
    except Exception:  # defensive: never fail on detection
        return ""


def _depthwise_dtype(kind=None):
    """bf16 depthwise compute on v6e/v7x (native bf16 VALU); f32 on v5e and older."""
    kind = _device_kind() if kind is None else kind
    if any(t in kind for t in ("v2", "v3", "v4", "v5")):
        return jnp.float32
    return jnp.bfloat16


def _vmem_limit_bytes(kind=None):
    """Per-generation scoped-VMEM budget (v7x only has 64 MiB physical VMEM)."""
    kind = _device_kind() if kind is None else kind
    if "v7" in kind or "7x" in kind:
        return 48 * 1024 * 1024
    return 96 * 1024 * 1024  # v5e / v6e have 128 MiB physical


def _tile_vmem_estimate(TH, K, W, Wp, Cp, Coutp, cbytes):
    """Rough per-step VMEM footprint: double-buffered blocks + in-kernel temps."""
    f32 = 4
    in_blk = TH * Wp * Cp * f32                        # main input block
    halo = (K - 1) * Wp * Cp * f32                     # halo rows
    out_blk = TH * W * Coutp * f32
    weights = (K * K * Cp + 2 * Cp) * cbytes + Cp * Coutp * 2 + Coutp * f32
    pipeline = 2 * (in_blk + halo + out_blk)           # default Buffered(2)
    temps = (TH + K - 1) * Wp * Cp * cbytes            # casted halo'd window
    temps += (TH + K - 1) * W * Cp * cbytes            # one kw-shifted window
    temps += 2 * TH * W * Cp * cbytes                  # tap accumulator + dw
    temps += TH * W * Cp * 2                           # bf16 matmul operand
    temps += 2 * TH * W * Coutp * f32                  # matmul result + epilogue
    return pipeline + 2 * weights + temps


def _pick_h_tile(H, K, W, Wp, Cp, Coutp, cbytes, vmem_limit):
    """Largest divisor of H whose estimated footprint fits the VMEM budget."""
    budget = int(0.6 * vmem_limit)
    for th in sorted((d for d in range(1, H + 1) if H % d == 0), reverse=True):
        if _tile_vmem_estimate(th, K, W, Wp, Cp, Coutp, cbytes) <= budget:
            return th
    return 1


def _dwsep_kernel(K, TH, W, Cp, Coutp, cdt, *refs):
    """One (batch, H-tile) grid step.

    refs = [x_main, x_halo_0 .. x_halo_{K-2}, wdw, sdw, tdw, wpw, tpw, out]

    x_main : (1, TH, Wp, Cp) f32   main TH rows of the spatially-padded NHWC input
    x_halo : (1, 1,  Wp, Cp) f32   the K-1 rows directly below the main block
    wdw    : (K, K, Cp)      cdt   depthwise weights
    sdw,tdw: (1, Cp)         cdt   folded depthwise BN scale / (bias+BN) shift
    wpw    : (Cp, Coutp)     bf16  pointwise weights, BN scale pre-folded
    tpw    : (1, Coutp)      f32   folded pointwise shift
    out    : (1, TH, W, Coutp)
    """
    x_main = refs[0]
    halos = refs[1:K]
    wdw_ref, sdw_ref, tdw_ref, wpw_ref, tpw_ref, o_ref = refs[K:]

    # Assemble the halo'd window once, fusing the cast to the compute dtype.
    pieces = [x_main[0].astype(cdt)] + [r[0].astype(cdt) for r in halos]
    x = jnp.concatenate(pieces, axis=0)                 # (TH + K - 1, Wp, Cp)
    wdw = wdw_ref[...]                                  # hoisted single load

    # ---- depthwise KxK conv (stride 1), kw-outer ----
    # Only one kw-shifted window is live at a time (built and consumed per kw);
    # kh taps are leading-dim slices (cheap, no relayout).
    acc = None
    for kw in range(K):
        xk = x[:, kw:kw + W, :]                         # (TH+K-1, W, Cp)
        for kh in range(K):
            tap = xk[kh:kh + TH] * wdw[kh, kw]
            acc = tap if acc is None else acc + tap

    # Folded BatchNorm (+ conv bias) and ReLU.
    dw = jnp.maximum(acc * sdw_ref[...] + tdw_ref[...], 0.0)       # (TH, W, Cp)

    # ---- pointwise 1x1 conv == MXU matmul over channels (bf16 in, f32 acc) ----
    dw_mat = dw.reshape(TH * W, Cp).astype(jnp.bfloat16)
    pw = jnp.dot(dw_mat, wpw_ref[...], preferred_element_type=jnp.float32)
    pw = jnp.maximum(pw + tpw_ref[...], 0.0)

    o_ref[...] = pw.reshape(1, TH, W, Coutp).astype(o_ref.dtype)


def fold_and_pad_params(wdw_oihw, bdw, dw_bn, wpw_oihw, bpw, pw_bn, eps=1e-5,
                        compute_dtype=None):
    """PyTorch-layout params -> folded, lane-padded, kernel-layout params."""
    if compute_dtype is None:
        compute_dtype = _depthwise_dtype()
    C, _, K, _ = wdw_oihw.shape
    Cout = wpw_oihw.shape[0]
    Cp, Coutp = _round_up(C, LANE), _round_up(Cout, LANE)

    gdw, btdw, mdw, vdw = dw_bn
    gpw, btpw, mpw, vpw = pw_bn

    # Depthwise: y = conv(x) + bdw ; BN(y) = y*sdw + (beta - mean*sdw)
    sdw = gdw / jnp.sqrt(vdw + eps)
    tdw = btdw - mdw * sdw + bdw * sdw          # conv bias folded into the shift

    # Pointwise: z = dw @ W + bpw ; BN(z) = dw @ (W*spw) + (bpw*spw + beta - mean*spw)
    spw = gpw / jnp.sqrt(vpw + eps)
    tpw = btpw - mpw * spw + bpw * spw

    wdw = jnp.transpose(wdw_oihw[:, 0, :, :], (1, 2, 0))              # (K, K, C)
    wpw = jnp.transpose(wpw_oihw[:, :, 0, 0], (1, 0)) * spw[None, :]  # (C, Cout)

    # Zero-pad channel dims up to the lane width (padded channels stay exactly 0).
    wdw = jnp.pad(wdw, ((0, 0), (0, 0), (0, Cp - C))).astype(compute_dtype)
    sdw = jnp.pad(sdw, (0, Cp - C)).reshape(1, Cp).astype(compute_dtype)
    tdw = jnp.pad(tdw, (0, Cp - C)).reshape(1, Cp).astype(compute_dtype)
    wpw = jnp.pad(wpw, ((0, Cp - C), (0, Coutp - Cout))).astype(jnp.bfloat16)
    tpw = jnp.pad(tpw, (0, Coutp - Cout)).reshape(1, Coutp).astype(jnp.float32)

    return (wdw, sdw, tdw, wpw, tpw), (C, Cout, Cp, Coutp, K)


def depthwise_separable_conv_nhwc(x_nhwc, kparams, dims, *, stride=1, padding=1,
                                  h_tile=None):
    """Production path: channel-padded NHWC (N, H, W, Cp) -> (N, H, W, Coutp)."""
    wdw, sdw, tdw, wpw, tpw = kparams
    C, Cout, Cp, Coutp, K = dims
    if stride != 1:
        # TODO(synk): stride > 1 (MobileNet downsampling blocks) not implemented.
        raise NotImplementedError("stride > 1 not supported")
    p = padding
    if K % 2 != 1 or p != (K - 1) // 2:
        raise NotImplementedError("only 'same' padding with odd K is supported")
    N, H, W, Cpi = x_nhwc.shape
    assert Cpi == Cp, (Cpi, Cp)

    # Spatial zero border -- the only remaining wrapper-side HBM pass per layer.
    # TODO(synk): fold this zero-fill into the kernel (pl.when on boundary rows/cols).
    xp = jnp.pad(x_nhwc, ((0, 0), (p, p), (p, p), (0, 0)))
    Wp = W + 2 * p

    kind = _device_kind()
    vmem_limit = _vmem_limit_bytes(kind)
    cdt = wdw.dtype
    cbytes = jnp.dtype(cdt).itemsize

    TH = h_tile if h_tile is not None else _pick_h_tile(
        H, K, W, Wp, Cp, Coutp, cbytes, vmem_limit)
    assert H % TH == 0, (H, TH)
    T = H // TH

    kernel = functools.partial(_dwsep_kernel, K, TH, W, Cp, Coutp, cdt)
    const = lambda shape: pl.BlockSpec(shape, lambda n, h: (0,) * len(shape))

    # Main TH-row block plus K-1 single-row halo blocks taken from the same array.
    in_specs = [pl.BlockSpec((1, TH, Wp, Cp), lambda n, h: (n, h, 0, 0))]
    for j in range(K - 1):
        in_specs.append(
            pl.BlockSpec((1, 1, Wp, Cp),
                         lambda n, h, j=j: (n, (h + 1) * TH + j, 0, 0)))
    in_specs += [const((K, K, Cp)), const((1, Cp)), const((1, Cp)),
                 const((Cp, Coutp)), const((1, Coutp))]

    out = pl.pallas_call(
        kernel,
        out_shape=jax.ShapeDtypeStruct((N, H, W, Coutp), jnp.float32),
        grid_spec=pltpu.PrefetchScalarGridSpec(
            num_scalar_prefetch=0,
            grid=(N, T),
            in_specs=in_specs,
            out_specs=pl.BlockSpec((1, TH, W, Coutp), lambda n, h: (n, h, 0, 0)),
        ),
        compiler_params=pltpu.CompilerParams(
            dimension_semantics=("parallel", "parallel"),
            vmem_limit_bytes=vmem_limit),
    )(*([xp] * K), wdw, sdw, tdw, wpw, tpw)
    return out


def depthwise_separable_conv(x_nchw, kparams, dims, *, stride=1, padding=1,
                             h_tile=None):
    """PyTorch-layout adapter: (N, C, H, W) f32 -> (N, Cout, H, W) f32.

    In a full network keep activations in channel-padded NHWC and call
    depthwise_separable_conv_nhwc directly; the transpose / channel pad / slice
    here is only paid at the network boundary.
    """
    C, Cout, Cp, Coutp, K = dims
    x = jnp.transpose(x_nchw, (0, 2, 3, 1))                        # NCHW -> NHWC
    x = jnp.pad(x, ((0, 0), (0, 0), (0, 0), (0, Cp - C)))          # channel pad
    out = depthwise_separable_conv_nhwc(x, kparams, dims, stride=stride,
                                        padding=padding, h_tile=h_tile)
    return jnp.transpose(out[..., :Cout], (0, 3, 1, 2))


def _ref_forward(x, wdw_oihw, bdw, dw_bn, wpw_oihw, bpw, pw_bn, C, eps=1e-5):
    """Pure-JAX reference matching the PyTorch forward (eval-mode BN, unfolded)."""
    gdw, btdw, mdw, vdw = dw_bn
    gpw, btpw, mpw, vpw = pw_bn
    y = lax.conv_general_dilated(
        x, wdw_oihw, (1, 1), ((1, 1), (1, 1)),
        dimension_numbers=("NCHW", "OIHW", "NCHW"), feature_group_count=C)
    y = y + bdw[None, :, None, None]
    y = (y - mdw[None, :, None, None]) / jnp.sqrt(vdw + eps)[None, :, None, None]
    y = y * gdw[None, :, None, None] + btdw[None, :, None, None]
    y = jnp.maximum(y, 0.0)
    z = lax.conv_general_dilated(
        y, wpw_oihw, (1, 1), ((0, 0), (0, 0)),
        dimension_numbers=("NCHW", "OIHW", "NCHW"))
    z = z + bpw[None, :, None, None]
    z = (z - mpw[None, :, None, None]) / jnp.sqrt(vpw + eps)[None, :, None, None]
    z = z * gpw[None, :, None, None] + btpw[None, :, None, None]
    return jnp.maximum(z, 0.0)


if __name__ == "__main__":
    N, C, H, W = 2, 4, 16, 16
    Cout, K = 8, 3

    key = jax.random.PRNGKey(0)
    keys = jax.random.split(key, 10)

    x = jax.random.normal(keys[0], (N, C, H, W), jnp.float32)

    # Depthwise conv params (PyTorch layout: (C, 1, K, K)) + BN params.
    wdw_oihw = jax.random.normal(keys[1], (C, 1, K, K), jnp.float32) * 0.2
    bdw = jax.random.normal(keys[2], (C,), jnp.float32) * 0.1
    dw_bn = (1.0 + 0.1 * jax.random.normal(keys[3], (C,), jnp.float32),   # gamma
             0.1 * jax.random.normal(keys[4], (C,), jnp.float32),         # beta
             jnp.zeros((C,), jnp.float32),                                # running mean
             jnp.ones((C,), jnp.float32))                                 # running var

    # Pointwise conv params (PyTorch layout: (Cout, C, 1, 1)) + BN params.
    wpw_oihw = jax.random.normal(keys[5], (Cout, C, 1, 1), jnp.float32) * 0.2
    bpw = jax.random.normal(keys[6], (Cout,), jnp.float32) * 0.1
    pw_bn = (1.0 + 0.1 * jax.random.normal(keys[7], (Cout,), jnp.float32),
             0.1 * jax.random.normal(keys[8], (Cout,), jnp.float32),
             jnp.zeros((Cout,), jnp.float32),
             jnp.ones((Cout,), jnp.float32))

    kparams, dims = fold_and_pad_params(wdw_oihw, bdw, dw_bn, wpw_oihw, bpw, pw_bn)

    ref = _ref_forward(x, wdw_oihw, bdw, dw_bn, wpw_oihw, bpw, pw_bn, C)
    ref = jax.block_until_ready(ref)

    # bf16 depthwise + bf16 MXU operands (f32 accumulate) on v6e/v7x -> looser
    # max-abs tolerance than the all-f32 reference; f32-depthwise path (v5e) tighter.
    tol_max = 2e-1 if kparams[0].dtype == jnp.bfloat16 else 6e-2

    # Exercise both an explicit 2-tile H split and the auto (VMEM-budget) tile pick.
    for h_tile in (8, None):
        out = depthwise_separable_conv(x, kparams, dims, padding=1, h_tile=h_tile)
        out = jax.block_until_ready(out)
        assert out.shape == (N, Cout, H, W), out.shape
        err = jnp.abs(out - ref)
        max_err = float(jnp.max(err))
        mean_err = float(jnp.mean(err))
        assert max_err < tol_max, (h_tile, max_err)
        assert mean_err < 2.5e-2, (h_tile, mean_err)

    print("KERNEL_OK")
</pallas_src>

<mosaic_0001>
module attributes {stable_mosaic.version = 11 : i64} {
  func.func @_dwsep_kernel(%arg0: i32, %arg1: i32, %arg2: memref<1x8x18x128xf32, #tpu.memory_space<vmem>>, %arg3: memref<1x1x18x128xf32, #tpu.memory_space<vmem>>, %arg4: memref<1x1x18x128xf32, #tpu.memory_space<vmem>>, %arg5: memref<3x3x128xbf16, #tpu.memory_space<vmem>>, %arg6: memref<1x128xbf16, #tpu.memory_space<vmem>>, %arg7: memref<1x128xbf16, #tpu.memory_space<vmem>>, %arg8: memref<128x128xbf16, #tpu.memory_space<vmem>>, %arg9: memref<1x128xf32, #tpu.memory_space<vmem>>, %arg10: memref<1x8x16x128xf32, #tpu.memory_space<vmem>>) attributes {dimension_semantics = [#tpu.dimension_semantics<parallel>, #tpu.dimension_semantics<parallel>], iteration_bounds = array<i64: 2, 2>, scalar_prefetch = 0 : i64, scratch_operands = 0 : i64, tpu.core_type = #tpu.core_type<tc>, window_params = [{transform_indices = @transform_0, window_bounds = array<i64: 1, 8, 18, 128>}, {transform_indices = @transform_1, window_bounds = array<i64: 1, 1, 18, 128>}, {transform_indices = @transform_2, window_bounds = array<i64: 1, 1, 18, 128>}, {pipeline_mode = #tpu.pipeline_mode<synchronous>, transform_indices = @transform_3, window_bounds = array<i64: 3, 3, 128>}, {pipeline_mode = #tpu.pipeline_mode<synchronous>, transform_indices = @transform_4, window_bounds = array<i64: 1, 128>}, {pipeline_mode = #tpu.pipeline_mode<synchronous>, transform_indices = @transform_5, window_bounds = array<i64: 1, 128>}, {pipeline_mode = #tpu.pipeline_mode<synchronous>, transform_indices = @transform_6, window_bounds = array<i64: 128, 128>}, {pipeline_mode = #tpu.pipeline_mode<synchronous>, transform_indices = @transform_7, window_bounds = array<i64: 1, 128>}, {transform_indices = @transform_8, window_bounds = array<i64: 1, 8, 16, 128>}]} {
    %c0 = arith.constant 0 : index
    %c0_0 = arith.constant 0 : index
    %c0_1 = arith.constant 0 : index
    %c0_2 = arith.constant 0 : index
    %0 = vector.load %arg2[%c0, %c0_0, %c0_1, %c0_2] : memref<1x8x18x128xf32, #tpu.memory_space<vmem>>, vector<1x8x18x128xf32>
    %1 = vector.shape_cast %0 : vector<1x8x18x128xf32> to vector<8x18x128xf32>
    %2 = arith.truncf %1 : vector<8x18x128xf32> to vector<8x18x128xbf16>
    %c0_3 = arith.constant 0 : index
    %c0_4 = arith.constant 0 : index
    %c0_5 = arith.constant 0 : index
    %c0_6 = arith.constant 0 : index
    %3 = vector.load %arg3[%c0_3, %c0_4, %c0_5, %c0_6] : memref<1x1x18x128xf32, #tpu.memory_space<vmem>>, vector<1x1x18x128xf32>
    %4 = vector.shape_cast %3 : vector<1x1x18x128xf32> to vector<1x18x128xf32>
    %5 = arith.truncf %4 : vector<1x18x128xf32> to vector<1x18x128xbf16>
    %c0_7 = arith.constant 0 : index
    %c0_8 = arith.constant 0 : index
    %c0_9 = arith.constant 0 : index
    %c0_10 = arith.constant 0 : index
    %6 = vector.load %arg4[%c0_7, %c0_8, %c0_9, %c0_10] : memref<1x1x18x128xf32, #tpu.memory_space<vmem>>, vector<1x1x18x128xf32>
    %7 = vector.shape_cast %6 : vector<1x1x18x128xf32> to vector<1x18x128xf32>
    %8 = arith.truncf %7 : vector<1x18x128xf32> to vector<1x18x128xbf16>
    %9 = tpu.concatenate %2, %5, %8 in 0 : vector<8x18x128xbf16>, vector<1x18x128xbf16>, vector<1x18x128xbf16> -> vector<10x18x128xbf16>
    %c0_11 = arith.constant 0 : index
    %c0_12 = arith.constant 0 : index
    %c0_13 = arith.constant 0 : index
    %10 = vector.load %arg5[%c0_11, %c0_12, %c0_13] : memref<3x3x128xbf16, #tpu.memory_space<vmem>>, vector<3x3x128xbf16>
    %11 = vector.extract_strided_slice %9 {offsets = [0, 0, 0], sizes = [10, 16, 128], strides = [1, 1, 1]} : vector<10x18x128xbf16> to vector<10x16x128xbf16>
    %12 = vector.extract_strided_slice %11 {offsets = [0, 0, 0], sizes = [8, 16, 128], strides = [1, 1, 1]} : vector<10x16x128xbf16> to vector<8x16x128xbf16>
    %13 = vector.extract_strided_slice %10 {offsets = [0, 0, 0], sizes = [1, 1, 128], strides = [1, 1, 1]} : vector<3x3x128xbf16> to vector<1x1x128xbf16>
    %14 = vector.shape_cast %13 : vector<1x1x128xbf16> to vector<128xbf16>
    %15 = vector.shape_cast %14 : vector<128xbf16> to vector<1x1x128xbf16>
    %16 = vector.broadcast %15 : vector<1x1x128xbf16> to vector<8x16x128xbf16>
    %17 = arith.mulf %12, %16 : vector<8x16x128xbf16>
    %18 = vector.extract_strided_slice %11 {offsets = [1, 0, 0], sizes = [8, 16, 128], strides = [1, 1, 1]} : vector<10x16x128xbf16> to vector<8x16x128xbf16>
    %19 = vector.extract_strided_slice %10 {offsets = [1, 0, 0], sizes = [1, 1, 128], strides = [1, 1, 1]} : vector<3x3x128xbf16> to vector<1x1x128xbf16>
    %20 = vector.shape_cast %19 : vector<1x1x128xbf16> to vector<128xbf16>
    %21 = vector.shape_cast %20 : vector<128xbf16> to vector<1x1x128xbf16>
    %22 = vector.broadcast %21 : vector<1x1x128xbf16> to vector<8x16x128xbf16>
    %23 = arith.mulf %18, %22 : vector<8x16x128xbf16>
    %24 = arith.addf %17, %23 : vector<8x16x128xbf16>
    %25 = vector.extract_strided_slice %11 {offsets = [2, 0, 0], sizes = [8, 16, 128], strides = [1, 1, 1]} : vector<10x16x128xbf16> to vector<8x16x128xbf16>
    %26 = vector.extract_strided_slice %10 {offsets = [2, 0, 0], sizes = [1, 1, 128], strides = [1, 1, 1]} : vector<3x3x128xbf16> to vector<1x1x128xbf16>
    %27 = vector.shape_cast %26 : vector<1x1x128xbf16> to vector<128xbf16>
    %28 = vector.shape_cast %27 : vector<128xbf16> to vector<1x1x128xbf16>
    %29 = vector.broadcast %28 : vector<1x1x128xbf16> to vector<8x16x128xbf16>
    %30 = arith.mulf %25, %29 : vector<8x16x128xbf16>
    %31 = arith.addf %24, %30 : vector<8x16x128xbf16>
    %32 = vector.extract_strided_slice %9 {offsets = [0, 1, 0], sizes = [10, 16, 128], strides = [1, 1, 1]} : vector<10x18x128xbf16> to vector<10x16x128xbf16>
    %33 = vector.extract_strided_slice %32 {offsets = [0, 0, 0], sizes = [8, 16, 128], strides = [1, 1, 1]} : vector<10x16x128xbf16> to vector<8x16x128xbf16>
    %34 = vector.extract_strided_slice %10 {offsets = [0, 1, 0], sizes = [1, 1, 128], strides = [1, 1, 1]} : vector<3x3x128xbf16> to vector<1x1x128xbf16>
    %35 = vector.shape_cast %34 : vector<1x1x128xbf16> to vector<128xbf16>
    %36 = vector.shape_cast %35 : vector<128xbf16> to vector<1x1x128xbf16>
    %37 = vector.broadcast %36 : vector<1x1x128xbf16> to vector<8x16x128xbf16>
    %38 = arith.mulf %33, %37 : vector<8x16x128xbf16>
    %39 = arith.addf %31, %38 : vector<8x16x128xbf16>
    %40 = vector.extract_strided_slice %32 {offsets = [1, 0, 0], sizes = [8, 16, 128], strides = [1, 1, 1]} : vector<10x16x128xbf16> to vector<8x16x128xbf16>
    %41 = vector.extract_strided_slice %10 {offsets = [1, 1, 0], sizes = [1, 1, 128], strides = [1, 1, 1]} : vector<3x3x128xbf16> to vector<1x1x128xbf16>
    %42 = vector.shape_cast %41 : vector<1x1x128xbf16> to vector<128xbf16>
    %43 = vector.shape_cast %42 : vector<128xbf16> to vector<1x1x128xbf16>
    %44 = vector.broadcast %43 : vector<1x1x128xbf16> to vector<8x16x128xbf16>
    %45 = arith.mulf %40, %44 : vector<8x16x128xbf16>
    %46 = arith.addf %39, %45 : vector<8x16x128xbf16>
    %47 = vector.extract_strided_slice %32 {offsets = [2, 0, 0], sizes = [8, 16, 128], strides = [1, 1, 1]} : vector<10x16x128xbf16> to vector<8x16x128xbf16>
    %48 = vector.extract_strided_slice %10 {offsets = [2, 1, 0], sizes = [1, 1, 128], strides = [1, 1, 1]} : vector<3x3x128xbf16> to vector<1x1x128xbf16>
    %49 = vector.shape_cast %48 : vector<1x1x128xbf16> to vector<128xbf16>
    %50 = vector.shape_cast %49 : vector<128xbf16> to vector<1x1x128xbf16>
    %51 = vector.broadcast %50 : vector<1x1x128xbf16> to vector<8x16x128xbf16>
    %52 = arith.mulf %47, %51 : vector<8x16x128xbf16>
    %53 = arith.addf %46, %52 : vector<8x16x128xbf16>
    %54 = vector.extract_strided_slice %9 {offsets = [0, 2, 0], sizes = [10, 16, 128], strides = [1, 1, 1]} : vector<10x18x128xbf16> to vector<10x16x128xbf16>
    %55 = vector.extract_strided_slice %54 {offsets = [0, 0, 0], sizes = [8, 16, 128], strides = [1, 1, 1]} : vector<10x16x128xbf16> to vector<8x16x128xbf16>
    %56 = vector.extract_strided_slice %10 {offsets = [0, 2, 0], sizes = [1, 1, 128], strides = [1, 1, 1]} : vector<3x3x128xbf16> to vector<1x1x128xbf16>
    %57 = vector.shape_cast %56 : vector<1x1x128xbf16> to vector<128xbf16>
    %58 = vector.shape_cast %57 : vector<128xbf16> to vector<1x1x128xbf16>
    %59 = vector.broadcast %58 : vector<1x1x128xbf16> to vector<8x16x128xbf16>
    %60 = arith.mulf %55, %59 : vector<8x16x128xbf16>
    %61 = arith.addf %53, %60 : vector<8x16x128xbf16>
    %62 = vector.extract_strided_slice %54 {offsets = [1, 0, 0], sizes = [8, 16, 128], strides = [1, 1, 1]} : vector<10x16x128xbf16> to vector<8x16x128xbf16>
    %63 = vector.extract_strided_slice %10 {offsets = [1, 2, 0], sizes = [1, 1, 128], strides = [1, 1, 1]} : vector<3x3x128xbf16> to vector<1x1x128xbf16>
    %64 = vector.shape_cast %63 : vector<1x1x128xbf16> to vector<128xbf16>
    %65 = vector.shape_cast %64 : vector<128xbf16> to vector<1x1x128xbf16>
    %66 = vector.broadcast %65 : vector<1x1x128xbf16> to vector<8x16x128xbf16>
    %67 = arith.mulf %62, %66 : vector<8x16x128xbf16>
    %68 = arith.addf %61, %67 : vector<8x16x128xbf16>
    %69 = vector.extract_strided_slice %54 {offsets = [2, 0, 0], sizes = [8, 16, 128], strides = [1, 1, 1]} : vector<10x16x128xbf16> to vector<8x16x128xbf16>
    %70 = vector.extract_strided_slice %10 {offsets = [2, 2, 0], sizes = [1, 1, 128], strides = [1, 1, 1]} : vector<3x3x128xbf16> to vector<1x1x128xbf16>
    %71 = vector.shape_cast %70 : vector<1x1x128xbf16> to vector<128xbf16>
    %72 = vector.shape_cast %71 : vector<128xbf16> to vector<1x1x128xbf16>
    %73 = vector.broadcast %72 : vector<1x1x128xbf16> to vector<8x16x128xbf16>
    %74 = arith.mulf %69, %73 : vector<8x16x128xbf16>
    %75 = arith.addf %68, %74 : vector<8x16x128xbf16>
    %c0_14 = arith.constant 0 : index
    %c0_15 = arith.constant 0 : index
    %76 = vector.load %arg6[%c0_14, %c0_15] : memref<1x128xbf16, #tpu.memory_space<vmem>>, vector<1x128xbf16>
    %77 = vector.shape_cast %76 : vector<1x128xbf16> to vector<1x1x128xbf16>
    %78 = vector.broadcast %77 : vector<1x1x128xbf16> to vector<8x16x128xbf16>
    %79 = arith.mulf %75, %78 : vector<8x16x128xbf16>
    %c0_16 = arith.constant 0 : index
    %c0_17 = arith.constant 0 : index
    %80 = vector.load %arg7[%c0_16, %c0_17] : memref<1x128xbf16, #tpu.memory_space<vmem>>, vector<1x128xbf16>
    %81 = vector.shape_cast %80 : vector<1x128xbf16> to vector<1x1x128xbf16>
    %82 = vector.broadcast %81 : vector<1x1x128xbf16> to vector<8x16x128xbf16>
    %83 = arith.addf %79, %82 : vector<8x16x128xbf16>
    %cst = arith.constant 0.000000e+00 : bf16
    %84 = vector.broadcast %cst : bf16 to vector<8x16x128xbf16>
    %85 = arith.maximumf %83, %84 : vector<8x16x128xbf16>
    %86 = vector.shape_cast %85 : vector<8x16x128xbf16> to vector<128x128xbf16>
    %c0_18 = arith.constant 0 : index
    %c0_19 = arith.constant 0 : index
    %87 = vector.load %arg8[%c0_18, %c0_19] : memref<128x128xbf16, #tpu.memory_space<vmem>>, vector<128x128xbf16>
    %cst_20 = arith.constant dense<0.000000e+00> : vector<128x128xf32>
    %88 = tpu.matmul %86, %87, %cst_20 {dimension_numbers = #tpu.dot_dimension_numbers<[1], [0], [0], [1], [0, 0, 1, 1], [], []>} : vector<128x128xbf16>, vector<128x128xbf16>, vector<128x128xf32> -> vector<128x128xf32>
    %c0_21 = arith.constant 0 : index
    %c0_22 = arith.constant 0 : index
    %89 = vector.load %arg9[%c0_21, %c0_22] : memref<1x128xf32, #tpu.memory_space<vmem>>, vector<1x128xf32>
    %90 = vector.broadcast %89 : vector<1x128xf32> to vector<128x128xf32>
    %91 = arith.addf %88, %90 : vector<128x128xf32>
    %cst_23 = arith.constant 0.000000e+00 : f32
    %92 = vector.broadcast %cst_23 : f32 to vector<128x128xf32>
    %93 = arith.maximumf %91, %92 : vector<128x128xf32>
    %94 = vector.shape_cast %93 : vector<128x128xf32> to vector<1x8x16x128xf32>
    %c0_24 = arith.constant 0 : index
    %c0_25 = arith.constant 0 : index
    %c0_26 = arith.constant 0 : index
    %c0_27 = arith.constant 0 : index
    %95 = vector.load %arg10[%c0_24, %c0_25, %c0_26, %c0_27] : memref<1x8x16x128xf32, #tpu.memory_space<vmem>>, vector<1x8x16x128xf32>
    tpu.vector_store %arg10[%c0_24, %c0_25, %c0_26, %c0_27], %94 {strides = array<i32>} : memref<1x8x16x128xf32, #tpu.memory_space<vmem>>, vector<1x8x16x128xf32>,
    return
  }
  func.func @transform_0(%arg0: i32, %arg1: i32) -> (i32, i32, i32, i32) {
    %c0_i32 = arith.constant 0 : i32
    %c0_i32_0 = arith.constant 0 : i32
    %c0_i32_1 = arith.constant 0 : i32
    return %arg0, %arg1, %c0_i32, %c0_i32_0 : i32, i32, i32, i32
  }
  func.func @transform_1(%arg0: i32, %arg1: i32) -> (i32, i32, i32, i32) {
    %c1_i32 = arith.constant 1 : i32
    %0 = arith.addi %arg1, %c1_i32 : i32
    %c8_i32 = arith.constant 8 : i32
    %1 = arith.muli %0, %c8_i32 : i32
    %c0_i32 = arith.constant 0 : i32
    %2 = arith.addi %1, %c0_i32 : i32
    %c0_i32_0 = arith.constant 0 : i32
    %c0_i32_1 = arith.constant 0 : i32
    %c0_i32_2 = arith.constant 0 : i32
    return %arg0, %2, %c0_i32_0, %c0_i32_1 : i32, i32, i32, i32
  }
  func.func @transform_2(%arg0: i32, %arg1: i32) -> (i32, i32, i32, i32) {
    %c1_i32 = arith.constant 1 : i32
    %0 = arith.addi %arg1, %c1_i32 : i32
    %c8_i32 = arith.constant 8 : i32
    %1 = arith.muli %0, %c8_i32 : i32
    %c1_i32_0 = arith.constant 1 : i32
    %2 = arith.addi %1, %c1_i32_0 : i32
    %c0_i32 = arith.constant 0 : i32
    %c0_i32_1 = arith.constant 0 : i32
    %c0_i32_2 = arith.constant 0 : i32
    return %arg0, %2, %c0_i32, %c0_i32_1 : i32, i32, i32, i32
  }
  func.func @transform_3(%arg0: i32, %arg1: i32) -> (i32, i32, i32) {
    %c0_i32 = arith.constant 0 : i32
    %c0_i32_0 = arith.constant 0 : i32
    %c0_i32_1 = arith.constant 0 : i32
    %c0_i32_2 = arith.constant 0 : i32
    return %c0_i32, %c0_i32_0, %c0_i32_1 : i32, i32, i32
  }
  func.func @transform_4(%arg0: i32, %arg1: i32) -> (i32, i32) {
    %c0_i32 = arith.constant 0 : i32
    %c0_i32_0 = arith.constant 0 : i32
    %c0_i32_1 = arith.constant 0 : i32
    return %c0_i32, %c0_i32_0 : i32, i32
  }
  func.func @transform_5(%arg0: i32, %arg1: i32) -> (i32, i32) {
    %c0_i32 = arith.constant 0 : i32
    %c0_i32_0 = arith.constant 0 : i32
    %c0_i32_1 = arith.constant 0 : i32
    return %c0_i32, %c0_i32_0 : i32, i32
  }
  func.func @transform_6(%arg0: i32, %arg1: i32) -> (i32, i32) {
    %c0_i32 = arith.constant 0 : i32
    %c0_i32_0 = arith.constant 0 : i32
    %c0_i32_1 = arith.constant 0 : i32
    return %c0_i32, %c0_i32_0 : i32, i32
  }
  func.func @transform_7(%arg0: i32, %arg1: i32) -> (i32, i32) {
    %c0_i32 = arith.constant 0 : i32
    %c0_i32_0 = arith.constant 0 : i32
    %c0_i32_1 = arith.constant 0 : i32
    return %c0_i32, %c0_i32_0 : i32, i32
  }
  func.func @transform_8(%arg0: i32, %arg1: i32) -> (i32, i32, i32, i32) {
    %c0_i32 = arith.constant 0 : i32
    %c0_i32_0 = arith.constant 0 : i32
    %c0_i32_1 = arith.constant 0 : i32
    return %arg0, %arg1, %c0_i32, %c0_i32_0 : i32, i32, i32, i32
  }
}

</mosaic_0001>

<bundles_post_ra>
// kernel: tpu_custom_call.1
= control target key start
LH: loop header
LB: loop body
LE: loop exit
PB: predicated region body
PF: predicated region fallthrough
CT: control target
= control target key end

     0   :  { %13 = vsyncpa [#allocation3], 0  ;;  %s2610_s0 = inlined_call_operand.vmem [shape: f32[2,18,18,128], index: 0, kind: input, shape index: {}]   ;;  %s2611_s1 = inlined_call_operand.vmem [shape: f32[2,18,18,128], index: 1, kind: input, shape index: {}]   ;;  %s2612_s2 = inlined_call_operand.vmem [shape: f32[2,18,18,128], index: 2, kind: input, shape index: {}]   ;;  %s2613_s3 = inlined_call_operand.vmem [shape: bf16[3,3,128], index: 3, kind: input, shape index: {}]   ;;  %s2614_s4 = inlined_call_operand.vmem [shape: bf16[1,128], index: 4, kind: input, shape index: {}]   ;;  %s2615_s5 = inlined_call_operand.vmem [shape: bf16[1,128], index: 5, kind: input, shape index: {}]   ;;  %s2616_s6 = inlined_call_operand.vmem [shape: bf16[128,128], index: 6, kind: input, shape index: {}]   ;;  %s2617_s7 = inlined_call_operand.vmem [shape: f32[1,128], index: 7, kind: input, shape index: {}]   ;;  %s2618_s8 = inlined_call_operand.hbm [shape: f32[2,16,16,128], index: 8, kind: output, shape index: {}]  }
   0x1   :  { %15 = vsyncpa [#allocation3 + $0x1], 0  ;;  %s1938_s27 = smov 0   ;;  %s1940_s28 = smov 0  }
   0x2   :  { %s1942_s29 = smov 0   ;;  %s1944_s30 = smov 0  }
   0x3   :  { %s1946_s9 = smov 0   ;;  %s1948_s10 = smov 0  }
   0x4   :  { %s1950_s11 = smov 0   ;;  %s1952_s12 = smov 0  }
   0x5 LB: > { %2623 = sst [smem:[#allocation5_spill]] %s1879_s10  ;;  %s1600_s13 = sadd.s32 4294967295, %s1887_s12   ;;  %s1887_s12 = sphi %s1952_s12, %s21_s12   ;;  %s1883_s11 = sphi %s1950_s11, %s2633_s11   ;;  %s1879_s10 = sphi %s1948_s10, %s2632_s10   ;;  %s1875_s9 = sphi %s1946_s9, %s2631_s9   ;;  %s1871_s30 = sphi %s1944_s30, %s2630_s30   ;;  %s1867_s29 = sphi %s1942_s29, %s2636_s29   ;;  %s1863_s28 = sphi %s1940_s28, %s2635_s28   ;;  %s1859_s27 = sphi %s1938_s27, %s2634_s27  }
   0x6   : > { %2624 = sst [smem:[#allocation6_spill]] %s1883_s11  ;;  %s1601_s14 = sadd.s32 4294967294, %s1887_s12  }
   0x7   : > { %s30_s15 = sadd.s32 1, %s1879_s10  ;;  %s33_s16 = sadd.s32 1, %s1883_s11 }
   0x8   : > { %p31_p0 = scmp.ge.s32.totalorder %s30_s15, 2  ;;  %p251_p1 = scmp.ne.s32.totalorder %s1867_s29, %s1863_s28 }
   0x9   : > { %p252_p2 = scmp.eq.s32.totalorder %s1600_s13, 3  ;;  %p257_p5 = scmp.ne.s32.totalorder %s1863_s28, %s1859_s27 }
   0xa   : > { %s2638_s15 = smov (%p31_p0, %s30_s15), 0  ;;  %s2640_s16 = smov (!%p31_p0, %s33_s16), %s1883_s11 }
   0xb   : > { %2625 = sst [smem:[#allocation7_spill]] %s2638_s15  ;;  %s237_s17 = ssub.s32 %s1879_s10, %s2638_s15 }
   0xc   : > { %p1989_p3 = por %p252_p2, %p251_p1  ;;  %p35_p4 = scmp.ge.s32.totalorder %s2640_s16, 2 }
   0xd   : > { %p258_p6 = scmp.eq.s32.totalorder %s1601_s14, 3  ;;  %p1608_p7 = scmp.ge.s32.totalorder %s1887_s12, 1 }
   0xe   : > { %s2642_s16 = smov (%p35_p4, %s2640_s16), 0  ;;  %p349_p9 = scmp.lt.s32.totalorder %s1887_s12, 5 }
   0xf   : > { %2627 = sst [smem:[#allocation8_spill]] %s2642_s16  ;;  %p1998_p8 = por %p258_p6, %p257_p5 }
  0x10   : > { %s236_s20 = ssub.s32 %s1883_s11, %s2642_s16  ;;  %s241_s21 = sadd.s32 1, %s1867_s29 }
  0x11   : > { %s238_s22 = sor.u32 %s237_s17, %s236_s20  ;;  %p350_p10 = pnand %p1608_p7, %p349_p9 }
  0x12   : > { %p239_p11 = scmp.eq.s32.totalorder %s238_s22, 0  ;;  %s2013_s26 = sshll.u32 (!%p350_p10), %s1871_s30, 3 }
  0x13   : > { %353 = sbr.rel (%p350_p10) target bundleno = 382 (0x17e), region = 52  ;;  %p422_p12 = scmp.lt.s32.totalorder (!%p350_p10), %s1875_s9, 1 }
  0x14   : > { %s2007_s23 = scalar_select %p239_p11, %s1867_s29, %s241_s21  }
  0x15   : > { %p424_p13 = scmp.lt.s32.totalorder (!%p350_p10), %s2013_s26, 17  ;;  %s1628_s21 = sshll.u32 (!%p350_p10), %s1875_s9, 5 }
  0x18   : > { %v1787_v0 = vld [vmem:[%s2616_s6 + $0x38] sm:$0xff]   ;;  %v1788_v1 = vld [vmem:[%s2616_s6 + $0x30] sm:$0xff]   ;;  %s423_s17 = scalar_select %p422_p12, %s1875_s9, 1  ;;  %v523_v2 = vlaneseq  ;;  %v1789_v3 = vld [vmem:[%s2616_s6 + $0x28] sm:$0xff]   ;;  %vm604_vm0 = vsmask.f32 7424 }
  0x19   : > { %1661 = vmatprep.subr.bf16.mxu0 %v1787_v0  ;;  %1693 = vmatprep.subr.bf16.mxu1 %v1787_v0  ;;  %s425_s22 = scalar_select %p424_p13, %s2013_s26, 17  ;;  %v1790_v4 = vld [vmem:[%s2616_s6 + $0x20] sm:$0xff]   ;;  %v1791_v13 = vld [vmem:[%s2616_s6 + $0x18] sm:$0xff]   ;;  %v1792_v43 = vld [vmem:[%s2616_s6 + $0x10] sm:$0xff]   ;;  %vm1023_vm1 = vcmask 1046528  }
  0x1a   : > { %1662 = vmatpush3.bf16.msra.mxu0 %v1787_v0  ;;  %1701 = vmatpush3.bf16.msra.mxu1 %v1787_v0  ;;  %s2025_s24 = smul.u32 54, %s423_s17  ;;  %v524_v5 = vshrl.u32 %v523_v2, 7  ;;  %v517_v6 = vld [vmem:[%s2613_s3] sm:$0x3]  ;;  %v518_v7 = vld [vmem:[%s2613_s3 + $0x2] sm:$0x3] }
  0x1b   : > { %1663 = vmatprep.subr.bf16.mxu0 %v1788_v1  ;;  %1694 = vmatprep.subr.bf16.mxu1 %v1788_v1  ;;  %s1709_s25 = smul.u32 3, %s425_s22  ;;  %v519_v8 = vld [vmem:[%s2613_s3 + $0x4] sm:$0x3]  ;;  %v2040_v9 = vpack.i.b16 %v517_v6, %v517_v6  ;;  %v2044_v11 = vpack.i.b16 %v518_v7, %v518_v7  ;;  %v581_v14 = vshrl.u32 %v517_v6, 16  ;;  %v717_v15 = vshrl.u32 %v518_v7, 16  ;;  %v1793_v60 = vld [vmem:[%s2616_s6 + $0x8] sm:$0xff]  }
  0x1c   : > { %v2042_v10 = vsub.s32 0, %v524_v5  ;;  %v2046_v12 = vpack.i.b16 %v519_v8, %v519_v8  ;;  %v852_v16 = vshrl.u32 %v519_v8, 16  ;;  %v989_v47 = vsub.s32 1, %v524_v5 }
  0x1d   : > { %s428_s16 = sadd.s32 %s2025_s24, %s1709_s25  ;;  %v582_v28 = vpack.i.b16 %v581_v14, %v581_v14  ;;  %v718_v34 = vpack.i.b16 %v717_v15, %v717_v15 }
  0x1e   : > { %1664 = vmatpush3.bf16.msra.mxu0 %v1788_v1  ;;  %1702 = vmatpush3.bf16.msra.mxu1 %v1788_v1  ;;  %s1611_s10 = sshll.u32 %s428_s16, 3  ;;  %s2057_s16 = sadd.s32 8, %s2013_s26  ;;  %v2064_v20 = vrot.slane %v2040_v9, %v2042_v10  ;;  %v2068_v21 = vrot.slane %v2044_v11, %v2042_v10  ;;  %v2072_v22 = vrot.slane %v2046_v12, %v2042_v10 }
  0x1f   : > { %1665 = vmatprep.subr.bf16.mxu0 %v1789_v3  ;;  %1695 = vmatprep.subr.bf16.mxu1 %v1789_v3  ;;  %s2054_s14 = scalar_lea.vmem %s2610_s0, %s1611_s10  ;;  %p441_p0 = scmp.lt.s32.totalorder %s2057_s16, 17  ;;  %v853_v35 = vpack.i.b16 %v852_v16, %v852_v16  ;;  %v2100_v39 = vrot.slane %v582_v28, %v2042_v10  ;;  %v2109_v41 = vrot.slane %v718_v34, %v2042_v10 }
  0x20   : > { %v467_v17 = vld [vmem:[%s2054_s14] sm:$0xff]  ;;  %v468_v18 = vld [vmem:[%s2054_s14 + $0x8] sm:$0xff]  ;;  %v469_v19 = vld [vmem:[%s2054_s14 + $0x10] sm:$0x3]  ;;  %s452_s10 = sadd.s32 1, %s2057_s16  ;;  %v2149_v7 = vrot.slane %v2044_v11, %v989_v47  ;;  %v2152_v8 = vrot.slane %v2046_v12, %v989_v47 }
  0x21   : > { %v470_v23 = vld [vmem:[%s2054_s14 + $0x18] sm:$0xff]  ;;  %v471_v24 = vld [vmem:[%s2054_s14 + $0x20] sm:$0xff]  ;;  %v472_v25 = vld [vmem:[%s2054_s14 + $0x28] sm:$0x3]  ;;  %v2078_v26 = vpack.c.bf16 %v468_v18, %v467_v17  ;;  %v2080_v27 = vpack.c.bf16 %v469_v19, %v469_v19  ;;  %s2644_s16 = smov (!%p441_p0, %s2057_s16), 17  ;;  %p2102_p1 = scmp.lt.s32.totalorder %s452_s10, 17  ;;  %v2112_v42 = vrot.slane %v853_v35, %v2042_v10 }
  0x22   : > { %1666 = vmatpush3.bf16.msra.mxu0 %v1789_v3  ;;  %1703 = vmatpush3.bf16.msra.mxu1 %v1789_v3  ;;  %v473_v29 = vld [vmem:[%s2054_s14 + $0x30] sm:$0xff]  ;;  %v474_v30 = vld [vmem:[%s2054_s14 + $0x38] sm:$0xff]  ;;  %v475_v31 = vld [vmem:[%s2054_s14 + $0x40] sm:$0x3]  ;;  %v2086_v32 = vpack.c.bf16 %v471_v24, %v470_v23  ;;  %v2088_v33 = vpack.c.bf16 %v472_v25, %v472_v25  ;;  %s1711_s20 = smul.u32 3, %s2644_s16  ;;  %s413_s16 = sand.u32 1, %s1863_s28  }
  0x23   : > { %1667 = vmatprep.subr.bf16.mxu0 %v1790_v4  ;;  %1696 = vmatprep.subr.bf16.mxu1 %v1790_v4  ;;  %v2093_v36 = vpack.c.bf16 %v474_v30, %v473_v29  ;;  %v2095_v37 = vpack.c.bf16 %v475_v31, %v475_v31  ;;  %v527_v38 = vmul.bf16 %v2064_v20, %v2078_v26  ;;  %s2646_s10 = smov (!%p2102_p1, %s452_s10), 17  ;;  %v1794_v11 = vld [vmem:[%s2616_s6] sm:$0xff]   ;;  %v480_v34 = vld [vmem:[%s2054_s14 + $0x68] sm:$0xff]  ;;  %v481_v35 = vld [vmem:[%s2054_s14 + $0x70] sm:$0x3] }
  0x24   : > { %v542_v40 = vmul.bf16 %v2068_v21, %v2086_v32  ;;  %v588_v45 = vmul.bf16 %v2100_v39, %v2078_v26  ;;  %v589_v46 = vmul.bf16 %v2100_v39, %v2080_v27  ;;  %v724_v49 = vmul.bf16 %v2109_v41, %v2086_v32  ;;  %s2134_s22 = sadd.s32 %s1711_s20, %s2025_s24  ;;  %s1712_s25 = smul.u32 3, %s2646_s10  ;;  %v1216_v25 = vld [vmem:[%s2614_s4] sm:$0x1] }
  0x25   : > { %v565_v44 = vmul.bf16 %v2072_v22, %v2093_v36  ;;  %v725_v50 = vmul.bf16 %v2109_v41, %v2088_v33  ;;  %v859_v51 = vmul.bf16 %v2112_v42, %v2093_v36  ;;  %v860_v55 = vmul.bf16 %v2112_v42, %v2095_v37  ;;  %v479_v31 = vld [vmem:[%s2054_s14 + $0x60] sm:$0xff]  ;;  %s1609_s20 = sshll.u32 %s413_s16, 7  ;;  %s1890_s10 = smov [#allocation2]  }
  0x26   : > { %1668 = vmatpush3.bf16.msra.mxu0 %v1790_v4  ;;  %1704 = vmatpush3.bf16.msra.mxu1 %v1790_v4  ;;  %v550_v48 = vadd.bf16 %v542_v40, %v527_v38  ;;  %v606_v52 = vshrl.u32 %v588_v45, 16  ;;  %v608_v53 = vshll.u32 %v588_v45, 16  ;;  %v613_v54 = vshll.u32 %v589_v46, 16  ;;  %s2146_s13 = sadd.s32 %s1712_s25, %s2025_s24  ;;  %v483_v45 = vld [vmem:[%s2054_s14 + $0x80] sm:$0xff]  ;;  %s2515_s17 = scalar_lea.vmem [#allocation2], %s1609_s20 }
  0x27   : > { %1669 = vmatprep.subr.bf16.mxu0 %v1791_v13  ;;  %1697 = vmatprep.subr.bf16.mxu1 %v1791_v13  ;;  %v741_v57 = vshrl.u32 %v724_v49, 16  ;;  %v743_v58 = vshll.u32 %v724_v49, 16  ;;  %v748_v59 = vshll.u32 %v725_v50, 16  ;;  %v876_v63 = vshrl.u32 %v859_v51, 16  ;;  %v484_v50 = vld [vmem:[%s2054_s14 + $0x88] sm:$0x3] }
  0x28   : > { %v573_v56 = vadd.bf16 %v565_v44, %v550_v48  ;;  %v610_v61 = vrot.slane %v608_v53, 1  ;;  %v615_v62 = vrot.slane %v613_v54, 1  ;;  %v878_v0 = vshll.u32 %v859_v51, 16  ;;  %v482_v44 = vld [vmem:[%s2054_s14 + $0x78] sm:$0xff]  ;;  %v485_v53 = vld [vmem:[%s2054_s14 + $0x90] sm:$0xff]  ;;  %s1615_s11 = sshll.u32 %s2146_s13, 3 }
  0x29   : > { %v745_v1 = vrot.slane %v743_v58, 1  ;;  %v750_v2 = vrot.slane %v748_v59, 1  ;;  %v883_v3 = vshll.u32 %v860_v55, 16  ;;  %v2143_v4 = vrot.slane %v2040_v9, %v989_v47  ;;  %v486_v54 = vld [vmem:[%s2054_s14 + $0x98] sm:$0xff]  ;;  %v487_v55 = vld [vmem:[%s2054_s14 + $0xa0] sm:$0x3]  ;;  %s461_s24 = scalar_lea.vmem %s2612_s2, %s1615_s11 }
  0x2a   : > { %1670 = vmatpush3.bf16.msra.mxu0 %v1791_v13  ;;  %1705 = vmatpush3.bf16.msra.mxu1 %v1791_v13  ;;  %v611_v5 = vor.u32 %v610_v61, %v606_v52  ;;  %v880_v6 = vrot.slane %v878_v0, 1  ;;  %v1068_v17 = vmul.bf16 %v2149_v7, %v2086_v32  ;;  %v1069_v28 = vmul.bf16 %v2149_v7, %v2088_v33  ;;  %s2559_s13 = scalar_lea.sflag [#allocation3], %s413_s16  ;;  %s1799_s26 = sshll.u32 %s1890_s10, 4  ;;  %s1800_s26 = int_to_ptr.vmem [resolvable:$false] %s1799_s26 }
  0x2b   : > { %1671 = vmatprep.subr.bf16.mxu0 %v1792_v43  ;;  %1698 = vmatprep.subr.bf16.mxu1 %v1792_v43  ;;  %v746_v13 = vor.u32 %v745_v1, %v741_v57  ;;  %v885_v14 = vrot.slane %v883_v3, 1  ;;  %v991_v15 = vmul.bf16 %v2143_v4, %v2078_v26  ;;  %v992_v9 = vmul.bf16 %v2143_v4, %v2080_v27  ;;  %v1232_v26 = vld [vmem:[%s2615_s5] sm:$0x1]  ;;  %s1801_s20 = scalar_lea.vmem %s1800_s26, 4096 }
  0x2c   : > { %v616_v12 = vsel %vm604_vm0, %v611_v5, %v615_v62  ;;  %v881_v16 = vor.u32 %v880_v6, %v876_v63  ;;  %v1100_v29 = vrot.slane %v1068_v17, 1  ;;  %v1144_v30 = vmul.bf16 %v2152_v8, %v2093_v36 }
  0x2d   : > { %v709_v18 = vadd.bf16 %v616_v12, %v573_v56  ;;  %v751_v19 = vsel %vm604_vm0, %v746_v13, %v750_v2  ;;  %v1024_v23 = vrot.slane %v991_v15, 1  ;;  %v1025_v24 = vrot.slane %v992_v9, 1 }
  0x2e   : > { %1672 = vmatpush3.bf16.msra.mxu0 %v1792_v43  ;;  %1706 = vmatpush3.bf16.msra.mxu1 %v1792_v43  ;;  %v886_v27 = vsel %vm604_vm0, %v881_v16, %v885_v14  ;;  %v1145_v43 = vmul.bf16 %v2152_v8, %v2095_v37  ;;  %v1101_v46 = vrot.slane %v1069_v28, 1  ;;  %v1176_v47 = vrot.slane %v1144_v30, 1 }
  0x2f   : > { %1673 = vmatprep.subr.bf16.mxu0 %v1793_v60  ;;  %1699 = vmatprep.subr.bf16.mxu1 %v1793_v60  ;;  %v844_v38 = vadd.bf16 %v751_v19, %v709_v18  ;;  %v1026_v40 = vsel %vm1023_vm1, %v1024_v23, %v1025_v24  ;;  %v1218_v48 = vpack.i.b16 %v1216_v25, %v1216_v25 }
  0x30   : > { %v1234_v49 = vpack.i.b16 %v1232_v26, %v1232_v26  ;;  %v1177_v52 = vrot.slane %v1145_v43, 1  ;;  %v2188_v56 = vpack.c.bf16 %v480_v34, %v479_v31  ;;  %v2190_v57 = vpack.c.bf16 %v481_v35, %v481_v35 }
  0x31   : > { %v979_v51 = vadd.bf16 %v886_v27, %v844_v38  ;;  %v1102_v58 = vsel %vm1023_vm1, %v1100_v29, %v1101_v46  ;;  %v2194_v59 = vrot.slane %v1218_v48, %v2042_v10  ;;  %v2199_v61 = vpack.c.bf16 %v483_v45, %v482_v44 }
  0x32   : > { %1674 = vmatpush3.bf16.msra.mxu0 %v1793_v60  ;;  %1707 = vmatpush3.bf16.msra.mxu1 %v1793_v60  ;;  %v2197_v60 = vrot.slane %v1234_v49, %v2042_v10  ;;  %v1178_v63 = vsel %vm1023_vm1, %v1176_v47, %v1177_v52  ;;  %v2202_v0 = vpack.c.bf16 %v484_v50, %v484_v50  ;;  %v1889_v50 = vmov 0  }
  0x33   : > { %1675 = vmatprep.subr.bf16.mxu0 %v1794_v11  ;;  %1700 = vmatprep.subr.bf16.mxu1 %v1794_v11  ;;  %v1056_v62 = vadd.bf16 %v1026_v40, %v979_v51  ;;  %v2204_v1 = vpack.c.bf16 %v486_v54, %v485_v53  ;;  %v2206_v2 = vpack.c.bf16 %v487_v55, %v487_v55  ;;  %v476_v55 = vld [vmem:[%s2054_s14 + $0x48] sm:$0xff] }
  0x34   : > { %v531_v3 = vmul.bf16 %v2064_v20, %v2188_v56  ;;  %v546_v10 = vmul.bf16 %v2068_v21, %v2199_v61  ;;  %v596_v6 = vmul.bf16 %v2100_v39, %v2188_v56  ;;  %v597_v13 = vmul.bf16 %v2100_v39, %v2190_v57 }
  0x35   : > { %v1132_v5 = vadd.bf16 %v1102_v58, %v1056_v62  ;;  %v732_v14 = vmul.bf16 %v2109_v41, %v2199_v61  ;;  %v569_v9 = vmul.bf16 %v2072_v22, %v2204_v1  ;;  %v867_v12 = vmul.bf16 %v2112_v42, %v2204_v1  ;;  %v477_v58 = vld [vmem:[%s2054_s14 + $0x50] sm:$0xff] }
  0x36   : > { %1676 = vmatpush3.bf16.msra.mxu0 %v1794_v11  ;;  %1708 = vmatpush3.bf16.msra.mxu1 %v1794_v11  ;;  %v554_v15 = vadd.bf16 %v546_v10, %v531_v3  ;;  %v733_v11 = vmul.bf16 %v2109_v41, %v2202_v0  ;;  %v654_v17 = vshrl.u32 %v596_v6, 16  ;;  %v656_v18 = vshll.u32 %v596_v6, 16 }
  0x37   : > { %v1208_v16 = vadd.bf16 %v1178_v63, %v1132_v5  ;;  %v661_v19 = vshll.u32 %v597_v13, 16  ;;  %v789_v24 = vshrl.u32 %v732_v14, 16  ;;  %v791_v25 = vshll.u32 %v732_v14, 16  ;;  %v478_v5 = vld [vmem:[%s2054_s14 + $0x58] sm:$0x3] }
  0x38   : > { %v577_v23 = vadd.bf16 %v569_v9, %v554_v15  ;;  %v796_v26 = vshll.u32 %v733_v11, 16  ;;  %v658_v28 = vrot.slane %v656_v18, 1  ;;  %v868_v30 = vmul.bf16 %v2112_v42, %v2206_v2 }
  0x39   : > { %v1224_v27 = vmul.bf16 %v2194_v59, %v1208_v16  ;;  %v663_v29 = vrot.slane %v661_v19, 1  ;;  %v793_v31 = vrot.slane %v791_v25, 1  ;;  %v924_v35 = vshrl.u32 %v867_v12, 16 }
  0x3a   : > { %v798_v34 = vrot.slane %v796_v26, 1  ;;  %v926_v38 = vshll.u32 %v867_v12, 16  ;;  %v659_v43 = vor.u32 %v658_v28, %v654_v17  ;;  %v931_v44 = vshll.u32 %v868_v30, 16 }
  0x3b   : > { %v1240_v40 = vadd.bf16 %v2197_v60, %v1224_v27  ;;  %v999_v45 = vmul.bf16 %v2143_v4, %v2188_v56  ;;  %v794_v46 = vor.u32 %v793_v31, %v789_v24  ;;  %v1000_v48 = vmul.bf16 %v2143_v4, %v2190_v57 }
  0x3c   : > { %v928_v47 = vrot.slane %v926_v38, 1  ;;  %v1076_v49 = vmul.bf16 %v2149_v7, %v2199_v61  ;;  %v664_v52 = vsel %vm604_vm0, %v659_v43, %v663_v29  ;;  %v933_v53 = vrot.slane %v931_v44, 1 }
  0x3d   : > { %v1248_v51 = vmax.bf16 %v1889_v50, %v1240_v40  ;;  %v1036_v54 = vrot.slane %v999_v45, 1  ;;  %v713_v62 = vadd.bf16 %v664_v52, %v577_v23  ;;  %v799_v63 = vsel %vm604_vm0, %v794_v46, %v798_v34 }
  0x3e   : > { %v929_v3 = vor.u32 %v928_v47, %v924_v35  ;;  %v1037_v10 = vrot.slane %v1000_v48, 1  ;;  %v1077_v6 = vmul.bf16 %v2149_v7, %v2202_v0  ;;  %v1112_v13 = vrot.slane %v1076_v49, 1 }
  0x3f   : > { %1677 = vmatprep.mubr.bf16.mxu0 %v1248_v51  ;;  %v1152_v14 = vmul.bf16 %v2152_v8, %v2204_v1  ;;  %v1153_v15 = vmul.bf16 %v2152_v8, %v2206_v2  ;;  %v848_v9 = vadd.bf16 %v799_v63, %v713_v62  ;;  %v2248_v16 = vpack.c.bf16 %v477_v58, %v476_v55 }
  0x40   : > { %v934_v11 = vsel %vm604_vm0, %v929_v3, %v933_v53  ;;  %v1038_v12 = vsel %vm1023_vm1, %v1036_v54, %v1037_v10  ;;  %v1113_v17 = vrot.slane %v1077_v6, 1  ;;  %v2250_v23 = vpack.c.bf16 %v478_v5, %v478_v5 }
  0x41   : > { %v1188_v18 = vrot.slane %v1152_v14, 1  ;;  %v1189_v19 = vrot.slane %v1153_v15, 1  ;;  %v983_v24 = vadd.bf16 %v934_v11, %v848_v9  ;;  %v528_v25 = vmul.bf16 %v2064_v20, %v2086_v32 }
  0x42   : > { %v543_v26 = vmul.bf16 %v2068_v21, %v2093_v36  ;;  %v566_v27 = vmul.bf16 %v2072_v22, %v2248_v16  ;;  %v1114_v28 = vsel %vm1023_vm1, %v1112_v13, %v1113_v17  ;;  %v590_v30 = vmul.bf16 %v2100_v39, %v2086_v32 }
  0x43   : > { %v1190_v29 = vsel %vm1023_vm1, %v1188_v18, %v1189_v19  ;;  %v591_v31 = vmul.bf16 %v2100_v39, %v2088_v33  ;;  %v1060_v34 = vadd.bf16 %v1038_v12, %v983_v24  ;;  %v726_v38 = vmul.bf16 %v2109_v41, %v2093_v36 }
  0x44   : > { %v551_v35 = vadd.bf16 %v543_v26, %v528_v25  ;;  %v727_v40 = vmul.bf16 %v2109_v41, %v2095_v37  ;;  %v618_v43 = vshrl.u32 %v590_v30, 16  ;;  %v620_v44 = vshll.u32 %v590_v30, 16 }
  0x45   : > { %v625_v45 = vshll.u32 %v591_v31, 16  ;;  %v861_v46 = vmul.bf16 %v2112_v42, %v2248_v16  ;;  %v1136_v47 = vadd.bf16 %v1114_v28, %v1060_v34  ;;  %v753_v49 = vshrl.u32 %v726_v38, 16  ;;  %v489_v28 = vld [vmem:[%s2054_s14 + $0xb0] sm:$0xff]  ;;  %v490_v34 = vld [vmem:[%s2054_s14 + $0xb8] sm:$0x3] }
  0x46   : > { %v574_v48 = vadd.bf16 %v566_v27, %v551_v35  ;;  %v755_v51 = vshll.u32 %v726_v38, 16  ;;  %v622_v52 = vrot.slane %v620_v44, 1  ;;  %v760_v54 = vshll.u32 %v727_v40, 16  ;;  %v488_v27 = vld [vmem:[%s2054_s14 + $0xa8] sm:$0xff]  ;;  %s1613_s14 = sshll.u32 %s2134_s22, 3 }
  0x47   : > { %v627_v53 = vrot.slane %v625_v45, 1  ;;  %v862_v55 = vmul.bf16 %v2112_v42, %v2250_v23  ;;  %v1212_v58 = vadd.bf16 %v1190_v29, %v1136_v47  ;;  %v888_v63 = vshrl.u32 %v861_v46, 16  ;;  %s447_s25 = scalar_lea.vmem %s2611_s1, %s1613_s14  ;;  %s1644_s14 = sshll.u32 %s1871_s30, 4 }
  0x48   : > { %v757_v62 = vrot.slane %v755_v51, 1  ;;  %v890_v3 = vshll.u32 %v861_v46, 16  ;;  %v623_v10 = vor.u32 %v622_v52, %v618_v43  ;;  %v762_v5 = vrot.slane %v760_v54, 1  ;;  %s1470_s22 = sadd.s32 %s1644_s14, %s1628_s21  ;;  %s1473_s30 = sshll.u32 %s2515_s17, 4  ;;  %s2553_s30 = int_to_ptr.vmem [resolvable:$true] %s1473_s30 }
  0x49   : > { %v895_v6 = vshll.u32 %v862_v55, 16  ;;  %v993_v13 = vmul.bf16 %v2143_v4, %v2086_v32  ;;  %v1228_v14 = vmul.bf16 %v2194_v59, %v1212_v58  ;;  %v994_v11 = vmul.bf16 %v2143_v4, %v2088_v33  ;;  %p1802_p6 = scmp.lt.s32.totalorder %s2553_s30, %s1800_s26 }
  0x4a   : > { %v758_v15 = vor.u32 %v757_v62, %v753_v49  ;;  %v892_v9 = vrot.slane %v890_v3, 1  ;;  %v628_v12 = vsel %vm604_vm0, %v623_v10, %v627_v53  ;;  %v1070_v19 = vmul.bf16 %v2149_v7, %v2093_v36 }
  0x4b   : > { %v897_v17 = vrot.slane %v895_v6, 1  ;;  %v1027_v18 = vrot.slane %v993_v13, 1  ;;  %v1244_v24 = vadd.bf16 %v2197_v60, %v1228_v14  ;;  %v710_v25 = vadd.bf16 %v628_v12, %v574_v48 }
  0x4c   : > { %v763_v32 = vsel %vm604_vm0, %v758_v15, %v762_v5  ;;  %v893_v26 = vor.u32 %v892_v9, %v888_v63  ;;  %v1028_v29 = vrot.slane %v994_v11, 1  ;;  %v1071_v30 = vmul.bf16 %v2149_v7, %v2095_v37 }
  0x4d   : > { %v1103_v33 = vrot.slane %v1070_v19, 1  ;;  %v1146_v31 = vmul.bf16 %v2152_v8, %v2248_v16  ;;  %v1252_v35 = vmax.bf16 %v1889_v50, %v1244_v24  ;;  %v845_v38 = vadd.bf16 %v763_v32, %v710_v25 }
  0x4e   : > { %v898_v40 = vsel %vm604_vm0, %v893_v26, %v897_v17  ;;  %v1147_v43 = vmul.bf16 %v2152_v8, %v2250_v23  ;;  %v1029_v44 = vsel %vm1023_vm1, %v1027_v18, %v1028_v29  ;;  %v1104_v45 = vrot.slane %v1071_v30, 1 }
  0x4f   : > { %v1179_v46 = vrot.slane %v1146_v31, 1  ;;  %v2294_v47 = vpack.c.bf16 %v489_v28, %v488_v27  ;;  %1685 = vmatprep.mubr.bf16.mxu1 %v1252_v35  ;;  %v980_v48 = vadd.bf16 %v898_v40, %v845_v38  ;;  %v2296_v51 = vpack.c.bf16 %v490_v34, %v490_v34 }
  0x50   : > { %v1180_v49 = vrot.slane %v1147_v43, 1  ;;  %v532_v52 = vmul.bf16 %v2064_v20, %v2199_v61  ;;  %v1105_v53 = vsel %vm1023_vm1, %v1103_v33, %v1104_v45  ;;  %v547_v54 = vmul.bf16 %v2068_v21, %v2204_v1 }
  0x51   : > { %v570_v55 = vmul.bf16 %v2072_v22, %v2294_v47  ;;  %v598_v58 = vmul.bf16 %v2100_v39, %v2199_v61  ;;  %v1057_v62 = vadd.bf16 %v1029_v44, %v980_v48  ;;  %v599_v3 = vmul.bf16 %v2100_v39, %v2202_v0 }
  0x52   : > { %v1181_v63 = vsel %vm1023_vm1, %v1179_v46, %v1180_v49  ;;  %v734_v10 = vmul.bf16 %v2109_v41, %v2204_v1  ;;  %v555_v5 = vadd.bf16 %v547_v54, %v532_v52  ;;  %v735_v14 = vmul.bf16 %v2109_v41, %v2206_v2 }
  0x53   : > { %v666_v6 = vshrl.u32 %v598_v58, 16  ;;  %v668_v13 = vshll.u32 %v598_v58, 16  ;;  %v1133_v15 = vadd.bf16 %v1105_v53, %v1057_v62  ;;  %v673_v9 = vshll.u32 %v599_v3, 16 }
  0x54   : > { %v801_v11 = vshrl.u32 %v734_v10, 16  ;;  %v803_v12 = vshll.u32 %v734_v10, 16  ;;  %v578_v17 = vadd.bf16 %v570_v55, %v555_v5  ;;  %v808_v19 = vshll.u32 %v735_v14, 16 }
  0x55   : > { %v670_v18 = vrot.slane %v668_v13, 1  ;;  %v869_v24 = vmul.bf16 %v2112_v42, %v2294_v47  ;;  %v1209_v25 = vadd.bf16 %v1181_v63, %v1133_v15  ;;  %v675_v32 = vrot.slane %v673_v9, 1 }
  0x56   : > { %v805_v26 = vrot.slane %v803_v12, 1  ;;  %v870_v27 = vmul.bf16 %v2112_v42, %v2296_v51  ;;  %v810_v29 = vrot.slane %v808_v19, 1  ;;  %v1001_v38 = vmul.bf16 %v2143_v4, %v2199_v61 }
  0x57   : > { %v671_v28 = vor.u32 %v670_v18, %v666_v6  ;;  %v936_v30 = vshrl.u32 %v869_v24, 16  ;;  %v938_v33 = vshll.u32 %v869_v24, 16  ;;  %v1225_v31 = vmul.bf16 %v2194_v59, %v1209_v25 }
  0x58   : > { %v806_v34 = vor.u32 %v805_v26, %v801_v11  ;;  %v943_v35 = vshll.u32 %v870_v27, 16  ;;  %v1002_v44 = vmul.bf16 %v2143_v4, %v2202_v0  ;;  %v1078_v45 = vmul.bf16 %v2149_v7, %v2204_v1 }
  0x59   : > { %v676_v40 = vsel %vm604_vm0, %v671_v28, %v675_v32  ;;  %v940_v43 = vrot.slane %v938_v33, 1  ;;  %v1241_v46 = vadd.bf16 %v2197_v60, %v1225_v31  ;;  %v1039_v54 = vrot.slane %v1001_v38, 1 }
  0x5a   : > { %v714_v48 = vadd.bf16 %v676_v40, %v578_v17  ;;  %v811_v49 = vsel %vm604_vm0, %v806_v34, %v810_v29  ;;  %v945_v52 = vrot.slane %v943_v35, 1  ;;  %v1040_v55 = vrot.slane %v1002_v44, 1 }
  0x5b   : > { %v941_v53 = vor.u32 %v940_v43, %v936_v30  ;;  %v1079_v58 = vmul.bf16 %v2149_v7, %v2206_v2  ;;  %v1249_v62 = vmax.bf16 %v1889_v50, %v1241_v46  ;;  %v1115_v3 = vrot.slane %v1078_v45, 1 }
  0x5c   : > { %v849_v63 = vadd.bf16 %v811_v49, %v714_v48  ;;  %v1154_v10 = vmul.bf16 %v2152_v8, %v2294_v47  ;;  %v1041_v6 = vsel %vm1023_vm1, %v1039_v54, %v1040_v55  ;;  %v1155_v14 = vmul.bf16 %v2152_v8, %v2296_v51 }
  0x5d   : > { %v946_v5 = vsel %vm604_vm0, %v941_v53, %v945_v52  ;;  %v1116_v13 = vrot.slane %v1079_v58, 1  ;;  %1678 = vmatmul.mubr.bf16.vlgmr.msra.gmra.mxu0 %v1249_v62  ;;  %v529_v11 = vmul.bf16 %v2064_v20, %v2093_v36  ;;  %v544_v12 = vmul.bf16 %v2068_v21, %v2248_v16 }
  0x5e   : > { %v984_v15 = vadd.bf16 %v946_v5, %v849_v63  ;;  %v1191_v9 = vrot.slane %v1154_v10, 1  ;;  %v1192_v18 = vrot.slane %v1155_v14, 1  ;;  %v567_v19 = vmul.bf16 %v2072_v22, %v2188_v56 }
  0x5f   : > { %v1117_v17 = vsel %vm1023_vm1, %v1115_v3, %v1116_v13  ;;  %v592_v24 = vmul.bf16 %v2100_v39, %v2093_v36  ;;  %v552_v32 = vadd.bf16 %v544_v12, %v529_v11  ;;  %v593_v26 = vmul.bf16 %v2100_v39, %v2095_v37  ;;  %v507_v12 = vld [vmem:[%s447_s25] sm:$0xff] }
  0x60   : > { %v1061_v25 = vadd.bf16 %v1041_v6, %v984_v15  ;;  %v728_v27 = vmul.bf16 %v2109_v41, %v2248_v16  ;;  %v1193_v28 = vsel %vm1023_vm1, %v1191_v9, %v1192_v18  ;;  %v729_v33 = vmul.bf16 %v2109_v41, %v2250_v23 }
  0x61   : > { %v630_v29 = vshrl.u32 %v592_v24, 16  ;;  %v632_v30 = vshll.u32 %v592_v24, 16  ;;  %v575_v34 = vadd.bf16 %v567_v19, %v552_v32  ;;  %v637_v35 = vshll.u32 %v593_v26, 16 }
  0x62   : > { %v1137_v31 = vadd.bf16 %v1117_v17, %v1061_v25  ;;  %v765_v38 = vshrl.u32 %v728_v27, 16  ;;  %v767_v43 = vshll.u32 %v728_v27, 16  ;;  %v772_v44 = vshll.u32 %v729_v33, 16  ;;  %v508_v17 = vld [vmem:[%s447_s25 + $0x8] sm:$0xff]  ;;  %v509_v25 = vld [vmem:[%s447_s25 + $0x10] sm:$0x3] }
  0x63   : > { %v634_v40 = vrot.slane %v632_v30, 1  ;;  %v863_v45 = vmul.bf16 %v2112_v42, %v2188_v56  ;;  %v639_v48 = vrot.slane %v637_v35, 1  ;;  %v864_v49 = vmul.bf16 %v2112_v42, %v2190_v57  ;;  %s1629_s25 = sshll.u32 %s1470_s22, 7 }
  0x64   : > { %v1213_v46 = vadd.bf16 %v1193_v28, %v1137_v31  ;;  %v995_v52 = vmul.bf16 %v2143_v4, %v2093_v36  ;;  %v769_v54 = vrot.slane %v767_v43, 1  ;;  %v774_v55 = vrot.slane %v772_v44, 1  ;;  %s2551_s15 = scalar_lea.hbm %s2618_s8, %s1629_s25 }
  0x65   : > { %v635_v53 = vor.u32 %v634_v40, %v630_v29  ;;  %v900_v58 = vshrl.u32 %v863_v45, 16  ;;  %v902_v63 = vshll.u32 %v863_v45, 16  ;;  %v907_v3 = vshll.u32 %v864_v49, 16 }
  0x66   : > { %v1229_v62 = vmul.bf16 %v2194_v59, %v1213_v46  ;;  %v996_v10 = vmul.bf16 %v2143_v4, %v2095_v37  ;;  %v770_v6 = vor.u32 %v769_v54, %v765_v38  ;;  %v1030_v13 = vrot.slane %v995_v52, 1 }
  0x67   : > { %v640_v5 = vsel %vm604_vm0, %v635_v53, %v639_v48  ;;  %v1072_v36 = vmul.bf16 %v2149_v7, %v2248_v16  ;;  %v904_v9 = vrot.slane %v902_v63, 1  ;;  %v909_v11 = vrot.slane %v907_v3, 1 }
  0x68   : > { %v1245_v14 = vadd.bf16 %v2197_v60, %v1229_v62  ;;  %v711_v15 = vadd.bf16 %v640_v5, %v575_v34  ;;  %v775_v18 = vsel %vm604_vm0, %v770_v6, %v774_v55  ;;  %v1031_v19 = vrot.slane %v996_v10, 1 }
  0x69   : > { %v1073_v37 = vmul.bf16 %v2149_v7, %v2250_v23  ;;  %v1106_v24 = vrot.slane %v1072_v36, 1  ;;  %v905_v27 = vor.u32 %v904_v9, %v900_v58  ;;  %v1148_v28 = vmul.bf16 %v2152_v8, %v2188_v56 }
  0x6a   : > { %v1253_v32 = vmax.bf16 %v1889_v50, %v1245_v14  ;;  %v846_v26 = vadd.bf16 %v775_v18, %v711_v15  ;;  %v1032_v29 = vsel %vm1023_vm1, %v1030_v13, %v1031_v19  ;;  %v1149_v33 = vmul.bf16 %v2152_v8, %v2190_v57 }
  0x6b   : > { %v1107_v30 = vrot.slane %v1073_v37, 1  ;;  %v2379_v31 = vpack.c.bf16 %v508_v17, %v507_v12  ;;  %v910_v34 = vsel %vm604_vm0, %v905_v27, %v909_v11  ;;  %v1182_v35 = vrot.slane %v1148_v28, 1 }
  0x6c   : > { %1686 = vmatmul.mubr.bf16.vlgmr.msra.gmra.mxu1 %v1253_v32  ;;  %v2382_v38 = vpack.c.bf16 %v509_v25, %v509_v25  ;;  %v533_v40 = vmul.bf16 %v2064_v20, %v2204_v1  ;;  %v981_v43 = vadd.bf16 %v910_v34, %v846_v26  ;;  %v1183_v45 = vrot.slane %v1149_v33, 1 }
  0x6d   : > { %v1108_v44 = vsel %vm1023_vm1, %v1106_v24, %v1107_v30  ;;  %v548_v46 = vmul.bf16 %v2068_v21, %v2294_v47  ;;  %v571_v48 = vmul.bf16 %v2072_v22, %v2379_v31  ;;  %v600_v49 = vmul.bf16 %v2100_v39, %v2204_v1 }
  0x6e   : > { %v601_v52 = vmul.bf16 %v2100_v39, %v2206_v2  ;;  %v736_v53 = vmul.bf16 %v2109_v41, %v2294_v47  ;;  %v1058_v54 = vadd.bf16 %v1032_v29, %v981_v43  ;;  %v1184_v55 = vsel %vm1023_vm1, %v1182_v35, %v1183_v45 }
  0x6f   : > { %v556_v58 = vadd.bf16 %v548_v46, %v533_v40  ;;  %v737_v62 = vmul.bf16 %v2109_v41, %v2296_v51  ;;  %v678_v63 = vshrl.u32 %v600_v49, 16  ;;  %v680_v3 = vshll.u32 %v600_v49, 16 }
  0x70   : > { %v685_v10 = vshll.u32 %v601_v52, 16  ;;  %v813_v5 = vshrl.u32 %v736_v53, 16  ;;  %v1134_v6 = vadd.bf16 %v1108_v44, %v1058_v54  ;;  %v815_v36 = vshll.u32 %v736_v53, 16 }
  0x71   : > { %v579_v13 = vadd.bf16 %v571_v48, %v556_v58  ;;  %v820_v14 = vshll.u32 %v737_v62, 16  ;;  %v682_v15 = vrot.slane %v680_v3, 1  ;;  %v871_v11 = vmul.bf16 %v2112_v42, %v2379_v31 }
  0x72   : > { %v687_v9 = vrot.slane %v685_v10, 1  ;;  %v872_v12 = vmul.bf16 %v2112_v42, %v2382_v38  ;;  %v1210_v17 = vadd.bf16 %v1184_v55, %v1134_v6  ;;  %v817_v18 = vrot.slane %v815_v36, 1 }
  0x73   : > { %v822_v19 = vrot.slane %v820_v14, 1  ;;  %v1003_v37 = vmul.bf16 %v2143_v4, %v2204_v1  ;;  %v683_v24 = vor.u32 %v682_v15, %v678_v63  ;;  %v948_v25 = vshrl.u32 %v871_v11, 16 }
  0x74   : > { %v950_v32 = vshll.u32 %v871_v11, 16  ;;  %v955_v26 = vshll.u32 %v872_v12, 16  ;;  %v1226_v27 = vmul.bf16 %v2194_v59, %v1210_v17  ;;  %v818_v28 = vor.u32 %v817_v18, %v813_v5 }
  0x75   : > { %v1004_v29 = vmul.bf16 %v2143_v4, %v2206_v2  ;;  %v1042_v30 = vrot.slane %v1003_v37, 1  ;;  %v688_v33 = vsel %vm604_vm0, %v683_v24, %v687_v9  ;;  %v1080_v40 = vmul.bf16 %v2149_v7, %v2294_v47 }
  0x76   : > { %v952_v34 = vrot.slane %v950_v32, 1  ;;  %v957_v35 = vrot.slane %v955_v26, 1  ;;  %v1242_v1 = vadd.bf16 %v2197_v60, %v1226_v27  ;;  %v715_v43 = vadd.bf16 %v688_v33, %v579_v13 }
  0x77   : > { %v823_v44 = vsel %vm604_vm0, %v818_v28, %v822_v19  ;;  %v1043_v45 = vrot.slane %v1004_v29, 1  ;;  %v1081_v48 = vmul.bf16 %v2149_v7, %v2296_v51  ;;  %v1118_v49 = vrot.slane %v1080_v40, 1 }
  0x78   : > { %v953_v46 = vor.u32 %v952_v34, %v948_v25  ;;  %v1156_v2 = vmul.bf16 %v2152_v8, %v2379_v31  ;;  %v1250_v52 = vmax.bf16 %v1889_v50, %v1242_v1  ;;  %v850_v53 = vadd.bf16 %v823_v44, %v715_v43 }
  0x79   : > { %v1044_v54 = vsel %vm1023_vm1, %v1042_v30, %v1043_v45  ;;  %v1157_v55 = vmul.bf16 %v2152_v8, %v2382_v38  ;;  %v1119_v62 = vrot.slane %v1081_v48, 1  ;;  %v530_v3 = vmul.bf16 %v2064_v20, %v2248_v16 }
  0x7a   : > { %v958_v58 = vsel %vm604_vm0, %v953_v46, %v957_v35  ;;  %v1194_v63 = vrot.slane %v1156_v2, 1  ;;  %1681 = vmatprep.mubr.bf16.mxu0 %v1250_v52  ;;  %v545_v6 = vmul.bf16 %v2068_v21, %v2188_v56  ;;  %v568_v13 = vmul.bf16 %v2072_v22, %v2199_v61 }
  0x7b   : > { %v985_v10 = vadd.bf16 %v958_v58, %v850_v53  ;;  %v1195_v5 = vrot.slane %v1157_v55, 1  ;;  %v1120_v36 = vsel %vm1023_vm1, %v1118_v49, %v1119_v62  ;;  %v594_v14 = vmul.bf16 %v2100_v39, %v2248_v16 }
  0x7c   : > { %v595_v15 = vmul.bf16 %v2100_v39, %v2250_v23  ;;  %v730_v9 = vmul.bf16 %v2109_v41, %v2188_v56  ;;  %v553_v17 = vadd.bf16 %v545_v6, %v530_v3  ;;  %v731_v18 = vmul.bf16 %v2109_v41, %v2190_v57  ;;  %v513_v6 = vld [vmem:[%s461_s24 + $0x8] sm:$0xff] }
  0x7d   : > { %v1062_v11 = vadd.bf16 %v1044_v54, %v985_v10  ;;  %v1196_v12 = vsel %vm1023_vm1, %v1194_v63, %v1195_v5  ;;  %v642_v19 = vshrl.u32 %v594_v14, 16  ;;  %v644_v37 = vshll.u32 %v594_v14, 16  ;;  %v512_v5 = vld [vmem:[%s461_s24] sm:$0xff] }
  0x7e   : > { %v649_v24 = vshll.u32 %v595_v15, 16  ;;  %v777_v25 = vshrl.u32 %v730_v9, 16  ;;  %v576_v26 = vadd.bf16 %v568_v13, %v553_v17  ;;  %v779_v27 = vshll.u32 %v730_v9, 16  ;;  %v514_v15 = vld [vmem:[%s461_s24 + $0x10] sm:$0x3]  ;;  %s1795_s24 = scalar_lea.vmem %s2553_s30, 2048 }
  0x7f   : > { %v1138_v32 = vadd.bf16 %v1120_v36, %v1062_v11  ;;  %v784_v28 = vshll.u32 %v731_v18, 16  ;;  %v646_v29 = vrot.slane %v644_v37, 1  ;;  %v865_v33 = vmul.bf16 %v2112_v42, %v2199_v61  ;;  %p1796_p2 = scmp.ne.s32.totalorder %s2553_s30, %s1795_s24  ;;  %p1803_p7 = scmp.lt.s32.totalorder %s1801_s20, %s1795_s24 }
  0x80   : > { %v651_v30 = vrot.slane %v649_v24, 1  ;;  %v866_v34 = vmul.bf16 %v2112_v42, %v2202_v0  ;;  %v781_v40 = vrot.slane %v779_v27, 1  ;;  %v997_v43 = vmul.bf16 %v2143_v4, %v2248_v16 }
  0x81   : > { %v1214_v35 = vadd.bf16 %v1196_v12, %v1138_v32  ;;  %v786_v1 = vrot.slane %v784_v28, 1  ;;  %v647_v44 = vor.u32 %v646_v29, %v642_v19  ;;  %v912_v45 = vshrl.u32 %v865_v33, 16  ;;  %p1797_p4 = pnand %p1796_p2, %p1989_p3  ;;  %p1804_p9 = por %p1803_p7, %p1802_p6 }
  0x82   : > { %v914_v46 = vshll.u32 %v865_v33, 16  ;;  %v919_v48 = vshll.u32 %v866_v34, 16  ;;  %v782_v2 = vor.u32 %v781_v40, %v777_v25  ;;  %v998_v52 = vmul.bf16 %v2143_v4, %v2250_v23 }
  0x83   : > { %v1230_v49 = vmul.bf16 %v2194_v59, %v1214_v35  ;;  %v1033_v53 = vrot.slane %v997_v43, 1  ;;  %v652_v54 = vsel %vm604_vm0, %v647_v44, %v651_v30  ;;  %v1074_v16 = vmul.bf16 %v2149_v7, %v2188_v56  ;;  %p1798_p5 = pneg %p1797_p4 }
  0x84   : > { %v916_v55 = vrot.slane %v914_v46, 1  ;;  %v921_v58 = vrot.slane %v919_v48, 1  ;;  %v712_v63 = vadd.bf16 %v652_v54, %v576_v26  ;;  %v787_v3 = vsel %vm604_vm0, %v782_v2, %v786_v1 }
  0x85   : > { %v1246_v62 = vadd.bf16 %v2197_v60, %v1230_v49  ;;  %v1034_v10 = vrot.slane %v998_v52, 1  ;;  %v1075_v23 = vmul.bf16 %v2149_v7, %v2190_v57  ;;  %v1109_v36 = vrot.slane %v1074_v16, 1  ;;  %p1805_p10 = pnand %p1804_p9, %p1798_p5 }
  0x86   : > { %v917_v13 = vor.u32 %v916_v55, %v912_v45  ;;  %v1150_v14 = vmul.bf16 %v2152_v8, %v2199_v61  ;;  %v847_v56 = vadd.bf16 %v787_v3, %v712_v63  ;;  %v1151_v12 = vmul.bf16 %v2152_v8, %v2202_v0 }
  0x87   : > { %v1254_v9 = vmax.bf16 %v1889_v50, %v1246_v62  ;;  %v1035_v11 = vsel %vm1023_vm1, %v1033_v53, %v1034_v10  ;;  %v1110_v18 = vrot.slane %v1075_v23, 1  ;;  %v515_v37 = vpack.c.bf16 %v513_v6, %v512_v5 }
  0x88   : > { %v922_v17 = vsel %vm604_vm0, %v917_v13, %v921_v58  ;;  %v1185_v19 = vrot.slane %v1150_v14, 1  ;;  %v1186_v24 = vrot.slane %v1151_v12, 1  ;;  %v516_v25 = vpack.c.bf16 %v514_v15, %v514_v15 }
  0x89   : > { %1689 = vmatprep.mubr.bf16.mxu1 %v1254_v9  ;;  %v982_v57 = vadd.bf16 %v922_v17, %v847_v56  ;;  %v534_v61 = vmul.bf16 %v2064_v20, %v2294_v47  ;;  %v1111_v32 = vsel %vm1023_vm1, %v1109_v36, %v1110_v18  ;;  %v549_v26 = vmul.bf16 %v2068_v21, %v2379_v31 }
  0x8a   : > { %v572_v27 = vmul.bf16 %v2072_v22, %v515_v37  ;;  %v602_v0 = vmul.bf16 %v2100_v39, %v2294_v47  ;;  %v1187_v29 = vsel %vm1023_vm1, %v1185_v19, %v1186_v24  ;;  %v603_v30 = vmul.bf16 %v2100_v39, %v2296_v51 }
  0x8b   : > { %v1059_v28 = vadd.bf16 %v1035_v11, %v982_v57  ;;  %v738_v33 = vmul.bf16 %v2109_v41, %v2379_v31  ;;  %v557_v20 = vadd.bf16 %v549_v26, %v534_v61  ;;  %v739_v21 = vmul.bf16 %v2109_v41, %v2382_v38 }
  0x8c   : > { %v690_v34 = vshrl.u32 %v602_v0, 16  ;;  %v692_v35 = vshll.u32 %v602_v0, 16  ;;  %v697_v22 = vshll.u32 %v603_v30, 16  ;;  %v873_v48 = vmul.bf16 %v2112_v42, %v515_v37 }
  0x8d   : > { %v1135_v40 = vadd.bf16 %v1111_v32, %v1059_v28  ;;  %v825_v1 = vshrl.u32 %v738_v33, 16  ;;  %v827_v43 = vshll.u32 %v738_v33, 16  ;;  %v580_v44 = vadd.bf16 %v572_v27, %v557_v20 }
  0x8e   : > { %v694_v45 = vrot.slane %v692_v35, 1  ;;  %v832_v46 = vshll.u32 %v739_v21, 16  ;;  %v699_v39 = vrot.slane %v697_v22, 1  ;;  %v874_v52 = vmul.bf16 %v2112_v42, %v516_v25 }
  0x8f   : > { %v1211_v49 = vadd.bf16 %v1187_v29, %v1135_v40  ;;  %v829_v2 = vrot.slane %v827_v43, 1  ;;  %v960_v55 = vshrl.u32 %v873_v48, 16  ;;  %v962_v58 = vshll.u32 %v873_v48, 16 }
  0x90   : > { %v695_v53 = vor.u32 %v694_v45, %v690_v34  ;;  %v834_v54 = vrot.slane %v832_v46, 1  ;;  %v967_v62 = vshll.u32 %v874_v52, 16  ;;  %v1005_v63 = vmul.bf16 %v2143_v4, %v2294_v47 }
  0x91   : > { %v1227_v41 = vmul.bf16 %v2194_v59, %v1211_v49  ;;  %v830_v16 = vor.u32 %v829_v2, %v825_v1  ;;  %v964_v10 = vrot.slane %v962_v58, 1  ;;  %v1006_v5 = vmul.bf16 %v2143_v4, %v2296_v51 }
  0x92   : > { %v700_v3 = vsel %vm604_vm0, %v695_v53, %v699_v39  ;;  %v1082_v42 = vmul.bf16 %v2149_v7, %v2379_v31  ;;  %v969_v36 = vrot.slane %v967_v62, 1  ;;  %v1045_v15 = vrot.slane %v1005_v63, 1 }
  0x93   : > { %v1243_v6 = vadd.bf16 %v2197_v60, %v1227_v41  ;;  %v716_v13 = vadd.bf16 %v700_v3, %v580_v44  ;;  %v835_v23 = vsel %vm604_vm0, %v830_v16, %v834_v54  ;;  %v965_v14 = vor.u32 %v964_v10, %v960_v55 }
  0x94   : > { %v1046_v9 = vrot.slane %v1006_v5, 1  ;;  %v1083_v47 = vmul.bf16 %v2149_v7, %v2382_v38  ;;  %v1121_v12 = vrot.slane %v1082_v42, 1  ;;  %v1158_v4 = vmul.bf16 %v2152_v8, %v515_v37 }
  0x95   : > { %v1251_v56 = vmax.bf16 %v1889_v50, %v1243_v6  ;;  %v851_v11 = vadd.bf16 %v835_v23, %v716_v13  ;;  %v970_v51 = vsel %vm604_vm0, %v965_v14, %v969_v36  ;;  %v1159_v18 = vmul.bf16 %v2152_v8, %v516_v25  ;;  %v2509_v8 = vld [vmem:[%s2617_s7] ss:$0 sm:$0xff] }
  0x96   : > { %v1047_v31 = vsel %vm1023_vm1, %v1045_v15, %v1046_v9  ;;  %v1122_v17 = vrot.slane %v1083_v47, 1  ;;  %v1197_v57 = vrot.slane %v1158_v4, 1 }
  0x97   : > { %1682 = vmatmul.mubr.bf16.gmra.mxu0 %v1251_v56  ;;  %v986_v19 = vadd.bf16 %v970_v51, %v851_v11  ;;  %v1198_v38 = vrot.slane %v1159_v18, 1 }
  0x98   : > { %v1123_v7 = vsel %vm1023_vm1, %v1121_v12, %v1122_v17 }
  0x99   : > { %v1063_v24 = vadd.bf16 %v1047_v31, %v986_v19  ;;  %v1199_v61 = vsel %vm1023_vm1, %v1197_v57, %v1198_v38 }
  0x9b   : > { %v1139_v32 = vadd.bf16 %v1123_v7, %v1063_v24 }
  0x9d   : > { %v1215_v37 = vadd.bf16 %v1199_v61, %v1139_v32 }
  0x9f   : > { %v1231_v26 = vmul.bf16 %v2194_v59, %v1215_v37 }
  0xa1   : > { %v1247_v27 = vadd.bf16 %v2197_v60, %v1231_v26 }
  0xa3   : > { %v1255_v0 = vmax.bf16 %v1889_v50, %v1247_v27 }
  0xa5   : > { %1690 = vmatmul.mubr.bf16.gmra.mxu1 %v1255_v0 }
 0x11d   : > { %v1679_v25 = vpop.f32.mrf.mxu0 }
 0x11e   : > { %v1370_v28 = vadd.f32 %v1679_v25, %v2509_v8 }
 0x11f   : > { %v1361_v29 = vpop.f32.mrf.mxu0 }
 0x120   : > { %v1426_v30 = vmax.f32 %v1370_v28, 0.0  ;;  %v1362_v59 = vadd.f32 %v2509_v8, %v1361_v29 }
 0x121   : > { %v1680_v33 = vpop.f32.mrf.mxu0 }
 0x122   : > { %1442 = vst [vmem:[%s2515_s17 + $0x10] sm:$0xff] %v1426_v30  ;;  %v1424_v60 = vmax.f32 %v1362_v59, 0.0  ;;  %v1373_v50 = vadd.f32 %v1680_v33, %v2509_v8 }
 0x123   : > { %v1364_v20 = vpop.f32.mrf.mxu0 }
 0x124   : > { %1440 = vst [vmem:[%s2515_s17] sm:$0xff] %v1424_v60  ;;  %v1427_v34 = vmax.f32 %v1373_v50, 0.0  ;;  %v1365_v35 = vadd.f32 %v2509_v8, %v1364_v20 }
 0x126   : > { %1443 = vst [vmem:[%s2515_s17 + $0x18] sm:$0xff] %v1427_v34  ;;  %v1425_v21 = vmax.f32 %v1365_v35, 0.0 }
 0x128   : > { %1441 = vst [vmem:[%s2515_s17 + $0x8] sm:$0xff] %v1425_v21 }
 0x12c   : > { %v1687_v40 = vpop.f32.mrf.mxu1 }
 0x12d   : > { %v1402_v22 = vadd.f32 %v1687_v40, %v2509_v8 }
 0x12e   : > { %v1393_v1 = vpop.f32.mrf.mxu1 }
 0x12f   : > { %v1434_v43 = vmax.f32 %v1402_v22, 0.0  ;;  %v1394_v44 = vadd.f32 %v2509_v8, %v1393_v1 }
 0x130   : > { %v1688_v45 = vpop.f32.mrf.mxu1 }
 0x131   : > { %1450 = vst [vmem:[%s2515_s17 + $0x50] sm:$0xff] %v1434_v43  ;;  %v1432_v46 = vmax.f32 %v1394_v44, 0.0  ;;  %v1405_v48 = vadd.f32 %v1688_v45, %v2509_v8 }
 0x132   : > { %v1396_v49 = vpop.f32.mrf.mxu1 }
 0x133   : > { %1448 = vst [vmem:[%s2515_s17 + $0x40] sm:$0xff] %v1432_v46  ;;  %v1435_v39 = vmax.f32 %v1405_v48, 0.0  ;;  %v1397_v2 = vadd.f32 %v2509_v8, %v1396_v49 }
 0x135   : > { %1451 = vst [vmem:[%s2515_s17 + $0x58] sm:$0xff] %v1435_v39  ;;  %v1433_v52 = vmax.f32 %v1397_v2, 0.0 }
 0x137   : > { %1449 = vst [vmem:[%s2515_s17 + $0x48] sm:$0xff] %v1433_v52 }
 0x157   : > { %v1683_v53 = vpop.f32.mrf.mxu0 }
 0x158   : > { %v1386_v54 = vadd.f32 %v1683_v53, %v2509_v8 }
 0x159   : > { %v1377_v55 = vpop.f32.mrf.mxu0 }
 0x15a   : > { %v1430_v58 = vmax.f32 %v1386_v54, 0.0  ;;  %v1378_v41 = vadd.f32 %v2509_v8, %v1377_v55 }
 0x15b   : > { %v1684_v16 = vpop.f32.mrf.mxu0 }
 0x15c   : > { %1446 = vst [vmem:[%s2515_s17 + $0x30] sm:$0xff] %v1430_v58  ;;  %v1428_v62 = vmax.f32 %v1378_v41, 0.0  ;;  %v1389_v63 = vadd.f32 %v1684_v16, %v2509_v8 }
 0x15d   : > { %v1380_v3 = vpop.f32.mrf.mxu0 }
 0x15e   : > { %1444 = vst [vmem:[%s2515_s17 + $0x20] sm:$0xff] %v1428_v62  ;;  %v1431_v10 = vmax.f32 %v1389_v63, 0.0  ;;  %v1381_v5 = vadd.f32 %v2509_v8, %v1380_v3 }
 0x160   : > { %1447 = vst [vmem:[%s2515_s17 + $0x38] sm:$0xff] %v1431_v10  ;;  %v1429_v42 = vmax.f32 %v1381_v5, 0.0 }
 0x162   : > { %1445 = vst [vmem:[%s2515_s17 + $0x28] sm:$0xff] %v1429_v42 }
 0x165   : > { %v1691_v6 = vpop.f32.mrf.mxu1 }
 0x166   : > { %v1418_v13 = vadd.f32 %v1691_v6, %v2509_v8 }
 0x167   : > { %v1409_v23 = vpop.f32.mrf.mxu1 }
 0x168   : > { %v1438_v36 = vmax.f32 %v1418_v13, 0.0  ;;  %v1410_v14 = vadd.f32 %v2509_v8, %v1409_v23 }
 0x169   : > { %v1692_v15 = vpop.f32.mrf.mxu1 }
 0x16a   : > { %1454 = vst [vmem:[%s2515_s17 + $0x70] sm:$0xff] %v1438_v36  ;;  %v1436_v9 = vmax.f32 %v1410_v14, 0.0  ;;  %v1421_v47 = vadd.f32 %v1692_v15, %v2509_v8 }
 0x16b   : > { %v1412_v56 = vpop.f32.mrf.mxu1 }
 0x16c   : > { %1452 = vst [vmem:[%s2515_s17 + $0x60] sm:$0xff] %v1436_v9  ;;  %v1439_v11 = vmax.f32 %v1421_v47, 0.0  ;;  %v1413_v12 = vadd.f32 %v2509_v8, %v1412_v56 }
 0x16e   : > { %1455 = vst [vmem:[%s2515_s17 + $0x78] sm:$0xff] %v1439_v11  ;;  %v1437_v4 = vmax.f32 %v1413_v12, 0.0 }
 0x170   : > { %1453 = vst [vmem:[%s2515_s17 + $0x68] sm:$0xff] %v1437_v4 }
 0x171   : > { %1808 = shalt.err (!%p1805_p10)
}
 0x172   : > { %s1809_s16 = scalar_lea.hbm %s2551_s15, 2048  ;;  %s1813_s21 = scalar_lea.hbm %s2618_s8, 8192 }
 0x173   : > { %p1810_p11 = scmp.ne.s32.totalorder %s2551_s15, %s1809_s16  ;;  %p1814_p0 = scmp.lt.s32.totalorder %s2551_s15, %s2618_s8 }
 0x174   : > { %p1815_p1 = scmp.lt.s32.totalorder %s1813_s21, %s1809_s16 }
 0x175   : > { %p1811_p12 = pnand %p1810_p11, %p1989_p3 }
 0x176   : > { %p1816_p2 = por %p1815_p1, %p1814_p0 }
 0x177   : > { %p1812_p13 = pneg %p1811_p12 }
 0x179   : > { %p1817_p4 = pnand %p1816_p2, %p1812_p13 }
 0x17b   : > { %1820 = shalt.err (!%p1817_p4)
}
 0x17c   : > { %s1891_s9 = smov 128   ;;  %s1892_s11 = smov 8  }
 0x17d   : > { %1713 = dma.vmem_to_hbm [thread:$0]  (%p1989_p3), %s2553_s30, 2048, %s2551_s15, %s2559_s13, %s1891_s9, %s1891_s9, %s1892_s11  }
 0x17e PF: > { %p1719_p5 = scmp.ge.s32.totalorder %s1887_s12, 2  ;;  %s1488_s24 = sand.u32 1, %s1859_s27  }
 0x17f   : > { %s1489_s10 = scalar_lea.sflag [#allocation3], %s1488_s24 }
 0x180   : > { %p1716_p6 = pnand %p1719_p5, %p1998_p8 }
 0x182   : > { %p1717_p7 = pneg %p1716_p6 }
 0x184   : > { %1854 = dma.done.wait (%p1717_p7), %s1489_s10, 2048  }
 0x185   : > { %1856 = vsyncadd (%p1717_p7), %s1489_s10, 4294965248  ;;  %s21_s12 = sadd.s32 1, %s1887_s12   ;;  %s2630_s30 = sld [smem:[#allocation5_spill]] }
 0x186   : > { %p18_p9 = scmp.ge.s32.totalorder %s21_s12, 6   ;;  %s2631_s9 = sld [smem:[#allocation6_spill]] }
 0x187   : > { %s2632_s10 = sld [smem:[#allocation7_spill]]  ;;  %s2634_s27 = smov %s1863_s28 }
 0x188   : > { %s2633_s11 = sld [smem:[#allocation8_spill]]  ;;  %s2635_s28 = smov %s1867_s29 }
 0x189   : > { %s2636_s29 = smov %s2007_s23  ;;  %20 = sbr.rel (!%p18_p9) target bundleno = 5 (0x5), region = 93 }
 0x18e   :  { %1494 = vsyncpa [#allocation3], 1 }
 0x18f   :  { %1496 = vsyncpa [#allocation3 + $0x1], 1 }

</bundles_post_ra>
